<compile_context>
chip_gen: v7x
topology: tpu7x:2x2x1
jax: 0.10.0
libtpu: 0.0.40
codegen_flags: <defaults>
</compile_context>

<pallas_src>
import functools

import jax
import jax.numpy as jnp
from jax import lax
from jax.experimental import pallas as pl
from jax.experimental.pallas import tpu as pltpu

_LEAKY_SLOPE = 0.1   # CNN_block uses nn.LeakyReLU(0.1)


# ----------------------------------------------------------------------------
# Fused kernel: conv1x1 + BN1 + leaky + conv3x3(pad=1) + BN2 + leaky + residual
# ----------------------------------------------------------------------------
def _fused_repeat_kernel(TH, W, Wp, use_residual,
                         x_main_ref, x_top_ref, x_bot_ref,
                         w1_ref, shift1_ref, w2_ref, shift2_ref,
                         o_ref, y1_scr, acc_scr):
    # x_main_ref : (1, TH, W, C)   rows [j*TH, (j+1)*TH) of the image
    # x_top_ref  : (1, 1,  W, C)   row j*TH - 1 (clamped; zeroed when j == 0)
    # x_bot_ref  : (1, 1,  W, C)   row (j+1)*TH (clamped; zeroed when last)
    # w1_ref     : (C, Cmid)       1x1 weights, BN1 scale folded in
    # shift1_ref : (1, Cmid)       BN1 shift (f32)
    # w2_ref     : (9, Cmid, C)    3x3 weights (index dy*3+dx), BN2 scale folded
    # shift2_ref : (1, C)          BN2 shift (f32)
    # o_ref      : (1, TH, W, C)
    # y1_scr     : (3, TH+2, Wp, Cmid)  tap-shifted y1 (left / center / right)
    # acc_scr    : (TH*Wp, C) f32       3x3 accumulator
    j = pl.program_id(1)
    n_strips = pl.num_programs(1)
    C = x_main_ref.shape[-1]
    Cmid = w1_ref.shape[-1]
    cdt = w1_ref.dtype                     # compute dtype (bf16 by default)
    M = TH * W
    Lw = (TH + 2) * W                      # strip + 2 halo rows, unpadded
    Mp = TH * Wp
    zero = jnp.zeros((), dtype=cdt)

    # ---- 1x1 conv + BN1 shift + LeakyReLU over strip + halo (one matmul) ---
    x_all = jnp.concatenate(
        [x_top_ref[0, 0], x_main_ref[0].reshape(M, C), x_bot_ref[0, 0]],
        axis=0).astype(cdt)                                    # (Lw, C)
    y1 = jnp.dot(x_all, w1_ref[...], preferred_element_type=jnp.float32)
    y1 = y1 + shift1_ref[...]
    y1 = jnp.maximum(y1, _LEAKY_SLOPE * y1)                    # LeakyReLU(0.1)
    y1 = y1.astype(cdt)                                        # (Lw, Cmid)

    # ---- build the three column-tap copies of y1 on the half-width cdt data
    # tap 0 reads column c-1, tap 1 column c, tap 2 column c+1.
    col = lax.broadcasted_iota(jnp.int32, (TH + 2, W, 1), 1)   # no modulo
    center = y1.reshape(TH + 2, W, Cmid)
    left = pltpu.roll(y1, shift=1, axis=0).reshape(TH + 2, W, Cmid)
    left = jnp.where(col == 0, zero, left)                     # col -1 == pad
    right = pltpu.roll(y1, shift=Lw - 1, axis=0).reshape(TH + 2, W, Cmid)
    right = jnp.where(col == W - 1, zero, right)               # col W  == pad

    y1_scr[0, :, 0:W, :] = left
    y1_scr[1, :, 0:W, :] = center
    y1_scr[2, :, 0:W, :] = right
    if Wp > W:                              # zero sublane-padding columns
        for t in range(3):
            y1_scr[t, :, W:Wp, :] = jnp.zeros((TH + 2, Wp - W, Cmid), cdt)

    # Halo rows outside the image are the 3x3 conv's vertical zero padding.
    @pl.when(j == 0)
    def _():
        for t in range(3):
            y1_scr[t, 0, :, :] = jnp.zeros((Wp, Cmid), cdt)

    @pl.when(j == n_strips - 1)
    def _():
        for t in range(3):
            y1_scr[t, TH + 1, :, :] = jnp.zeros((Wp, Cmid), cdt)

    # ---- 3x3 conv: 9 aligned matmuls accumulated into an f32 scratch -------
    # out[r, c] = sum_{dy,dx} y1[r + dy - 1, c + dx - 1] @ w2[dy, dx]
    first = True
    for dy in range(3):
        for dx in range(3):
            lhs = y1_scr[dx, dy:dy + TH, :, :].reshape(Mp, Cmid)
            part = jnp.dot(lhs, w2_ref[dy * 3 + dx],
                           preferred_element_type=jnp.float32)
            if first:
                acc_scr[...] = part
                first = False
            else:
                acc_scr[...] += part

    # ---- BN2 shift + LeakyReLU + residual + store ---------------------------
    y2 = acc_scr[...].reshape(TH, Wp, C)
    if Wp > W:
        y2 = y2[:, 0:W, :]
    y2 = y2 + shift2_ref[...].reshape(1, 1, C)
    y2 = jnp.maximum(y2, _LEAKY_SLOPE * y2)
    if use_residual:
        y2 = y2 + x_main_ref[0].astype(jnp.float32)
    o_ref[0] = y2.astype(o_ref.dtype)


# ----------------------------------------------------------------------------
# VMEM budgeting (generation-aware) and strip-height selection
# ----------------------------------------------------------------------------
def _round_up(x, m):
    return (x + m - 1) // m * m


def _vmem_capacity_bytes():
    try:
        return int(pltpu.get_tpu_info().vmem_capacity_bytes)
    except Exception:
        return 64 << 20          # conservative fallback (v7x-sized)


def _estimate_vmem_bytes(TH, W, Wp, C, Cmid, in_isz, cdt_isz):
    Lw, Mp, M = (TH + 2) * W, TH * Wp, TH * W
    io = 2 * 2 * M * C * in_isz                       # main in + out, dbl-buf
    halo = 2 * 2 * W * C * in_isz                     # two 1-row halos, dbl-buf
    weights = 2 * (C * Cmid + 9 * Cmid * C) * cdt_isz + 2 * (Cmid + C) * 4
    scratch = 3 * (TH + 2) * Wp * Cmid * cdt_isz + Mp * C * 4
    temps = (Lw * C * cdt_isz                         # concatenated conv1 input
             + Lw * Cmid * 4                          # conv1 f32 output
             + 2 * Lw * Cmid * cdt_isz                # rolled tap copies
             + Mp * C * 4                             # matmul partial / epilogue
             + 2 * M * C * 4)                         # y2 f32 + residual f32
    return io + halo + weights + scratch + temps


def _pick_strip_rows(N, H, W, Wp, C, Cmid, block_h, in_isz, cdt_isz):
    cap = _vmem_capacity_bytes()
    budget = max(cap * 3 // 8, 4 << 20)   # ~24 MiB on v7x, ~48 MiB on v5e/v6e
    if block_h is not None:
        if H % block_h != 0:
            raise ValueError(f"block_h={block_h} must divide H={H}")
        TH = block_h
    else:
        divisors = [d for d in range(1, H + 1) if H % d == 0]
        fits = [d for d in divisors
                if _estimate_vmem_bytes(d, W, Wp, C, Cmid, in_isz, cdt_isz)
                <= budget] or [1]
        TH = max(fits)
        # Megacore balance (v7x): prefer an even total grid when N is odd.
        if N % 2 == 1 and (H // TH) % 2 == 1:
            even = [d for d in fits if (H // d) % 2 == 0]
            if even:
                TH = max(even)
    est = _estimate_vmem_bytes(TH, W, Wp, C, Cmid, in_isz, cdt_isz)
    vmem_limit = int(min(cap, max(2 * est, 16 << 20)))
    return TH, vmem_limit


# ----------------------------------------------------------------------------
# Wrapper: strip-tiled pallas_call for one repeat
# ----------------------------------------------------------------------------
def _fused_repeat(x_nhwc, w1f, shift1, w2f, shift2, *,
                  use_residual, block_h, compute_dtype):
    N, H, W, C = x_nhwc.shape
    Cmid = w1f.shape[-1]
    cdt = jnp.dtype(compute_dtype)
    in_isz = jnp.dtype(x_nhwc.dtype).itemsize
    Wp = _round_up(W, 8)                 # padded row stride for the y1 scratch
    TH, vmem_limit = _pick_strip_rows(N, H, W, Wp, C, Cmid, block_h,
                                      in_isz, cdt.itemsize)
    n_strips = H // TH

    w1c = w1f.astype(cdt)                          # (C, Cmid)
    w2c = w2f.astype(cdt).reshape(9, Cmid, C)      # (3,3,Cmid,C) -> (9,Cmid,C)
    s1 = shift1.reshape(1, Cmid).astype(jnp.float32)
    s2 = shift2.reshape(1, C).astype(jnp.float32)

    kernel = functools.partial(_fused_repeat_kernel, TH, W, Wp, use_residual)

    return pl.pallas_call(
        kernel,
        out_shape=jax.ShapeDtypeStruct((N, H, W, C), x_nhwc.dtype),
        grid=(N, n_strips),
        in_specs=[
            # main strip: also serves as the residual input (no extra read)
            pl.BlockSpec((1, TH, W, C), lambda n, j: (n, j, 0, 0)),
            # 1-row halo above / below the strip (clamped, zeroed in-kernel)
            pl.BlockSpec((1, 1, W, C),
                         lambda n, j: (n, jnp.maximum(j * TH - 1, 0), 0, 0)),
            pl.BlockSpec((1, 1, W, C),
                         lambda n, j: (n, jnp.minimum(j * TH + TH, H - 1), 0, 0)),
            # weights / shifts: constant block index -> fetched once
            pl.BlockSpec((C, Cmid), lambda n, j: (0, 0)),
            pl.BlockSpec((1, Cmid), lambda n, j: (0, 0)),
            pl.BlockSpec((9, Cmid, C), lambda n, j: (0, 0, 0)),
            pl.BlockSpec((1, C), lambda n, j: (0, 0)),
        ],
        out_specs=pl.BlockSpec((1, TH, W, C), lambda n, j: (n, j, 0, 0)),
        scratch_shapes=[
            pltpu.VMEM((3, TH + 2, Wp, Cmid), cdt),     # tap-shifted y1
            pltpu.VMEM((TH * Wp, C), jnp.float32),      # 3x3 accumulator
        ],
        compiler_params=pltpu.CompilerParams(
            dimension_semantics=("parallel", "parallel"),
            vmem_limit_bytes=vmem_limit),
    )(x_nhwc, x_nhwc, x_nhwc, w1c, s1, w2c, s2)


# ----------------------------------------------------------------------------
# Parameters: eval-mode BN folded, scale folded INTO the conv weights
# ----------------------------------------------------------------------------
def _fold_bn(w, gamma, beta, mean, var, eps=1e-5):
    scale = gamma / jnp.sqrt(var + eps)
    shift = beta - mean * scale
    return w * scale, shift          # scale broadcasts over the Cout axis


def init_residual_block_params(key, channels, num_repeats):
    mid = channels // 2
    params = []
    for _ in range(num_repeats):
        key, *ks = jax.random.split(key, 11)
        w1 = 0.2 * jax.random.normal(ks[0], (channels, mid), jnp.float32)
        g1 = 1.0 + 0.1 * jax.random.normal(ks[1], (mid,), jnp.float32)
        b1 = 0.1 * jax.random.normal(ks[2], (mid,), jnp.float32)
        m1 = 0.1 * jax.random.normal(ks[3], (mid,), jnp.float32)
        v1 = 0.5 + jnp.abs(jax.random.normal(ks[4], (mid,), jnp.float32))
        w1f, sh1 = _fold_bn(w1, g1, b1, m1, v1)

        w2 = 0.2 * jax.random.normal(ks[5], (3, 3, mid, channels), jnp.float32)
        g2 = 1.0 + 0.1 * jax.random.normal(ks[6], (channels,), jnp.float32)
        b2 = 0.1 * jax.random.normal(ks[7], (channels,), jnp.float32)
        m2 = 0.1 * jax.random.normal(ks[8], (channels,), jnp.float32)
        v2 = 0.5 + jnp.abs(jax.random.normal(ks[9], (channels,), jnp.float32))
        w2f, sh2 = _fold_bn(w2, g2, b2, m2, v2)

        params.append(dict(w1f=w1f, shift1=sh1, w2f=w2f, shift2=sh2))
    return params


# ----------------------------------------------------------------------------
# Forward (matches Residual_block.forward in eval mode).  Inter-repeat
# activations are stored in compute_dtype (bf16 by default) to halve the HBM
# traffic per repeat; the residual add happens in f32 inside the kernel.
# ----------------------------------------------------------------------------
def residual_block_forward(x_nchw, params, use_residual=True, block_h=None,
                           compute_dtype=jnp.bfloat16):
    cdt = jnp.dtype(compute_dtype)
    x = jnp.transpose(x_nchw, (0, 2, 3, 1)).astype(cdt)      # NCHW -> NHWC
    for p in params:
        x = _fused_repeat(x, p['w1f'], p['shift1'], p['w2f'], p['shift2'],
                          use_residual=use_residual, block_h=block_h,
                          compute_dtype=compute_dtype)
    return jnp.transpose(x, (0, 3, 1, 2)).astype(x_nchw.dtype)


# ----------------------------------------------------------------------------
# Pure-JAX reference (lax convolutions, mirrors the kernel's precision policy:
# activations stored in compute_dtype, f32 accumulation, residual add in f32)
# ----------------------------------------------------------------------------
def residual_block_reference(x_nchw, params, use_residual=True,
                             compute_dtype=jnp.bfloat16):
    cdt = jnp.dtype(compute_dtype)
    x = jnp.transpose(x_nchw, (0, 2, 3, 1)).astype(cdt)
    for p in params:
        cin, cmid = p['w1f'].shape
        y = lax.conv_general_dilated(
            x, p['w1f'].astype(cdt).reshape(1, 1, cin, cmid),
            (1, 1), 'VALID', dimension_numbers=('NHWC', 'HWIO', 'NHWC'),
            preferred_element_type=jnp.float32,
            precision=lax.Precision.HIGHEST)
        y = y + p['shift1']
        y = jnp.maximum(y, _LEAKY_SLOPE * y)
        z = lax.conv_general_dilated(
            y.astype(cdt), p['w2f'].astype(cdt), (1, 1), 'SAME',
            dimension_numbers=('NHWC', 'HWIO', 'NHWC'),
            preferred_element_type=jnp.float32,
            precision=lax.Precision.HIGHEST)
        z = z + p['shift2']
        z = jnp.maximum(z, _LEAKY_SLOPE * z)
        z = z + x.astype(jnp.float32) if use_residual else z
        x = z.astype(cdt)
    return jnp.transpose(x, (0, 3, 1, 2)).astype(x_nchw.dtype)


if __name__ == "__main__":
    N, C, H, W = 2, 4, 16, 16
    num_repeats = 2

    key = jax.random.PRNGKey(0)
    kx, kp = jax.random.split(key)
    x = jax.random.normal(kx, (N, C, H, W), jnp.float32)
    params = init_residual_block_params(kp, C, num_repeats)

    # block_h=8 -> two row strips per image, so the halo / boundary handling
    # path is exercised.

    # (1) exact-math check: f32 compute, tight tolerance.
    run_f32 = jax.jit(functools.partial(residual_block_forward,
                                        use_residual=True, block_h=8,
                                        compute_dtype=jnp.float32))
    out_f32 = jax.block_until_ready(run_f32(x, params))
    ref_f32 = residual_block_reference(x, params, use_residual=True,
                                       compute_dtype=jnp.float32)
    assert out_f32.shape == (N, C, H, W)
    assert jnp.allclose(out_f32, ref_f32, atol=1e-3, rtol=1e-3), (
        "f32 mismatch vs reference, max abs err = "
        f"{float(jnp.max(jnp.abs(out_f32 - ref_f32)))}")

    # (2) default fast path: bf16 activations/MXU inputs, f32 accumulation.
    run_bf16 = jax.jit(functools.partial(residual_block_forward,
                                         use_residual=True, block_h=8,
                                         compute_dtype=jnp.bfloat16))
    out_bf16 = jax.block_until_ready(run_bf16(x, params))
    ref_bf16 = residual_block_reference(x, params, use_residual=True,
                                        compute_dtype=jnp.bfloat16)
    assert jnp.allclose(out_bf16, ref_bf16, atol=2e-2, rtol=2e-2), (
        "bf16 mismatch vs reference, max abs err = "
        f"{float(jnp.max(jnp.abs(out_bf16 - ref_bf16)))}")

    print("KERNEL_OK")
</pallas_src>

<mosaic_0001>
module attributes {stable_mosaic.version = 11 : i64} {
  func.func @_fused_repeat_kernel(%arg0: i32, %arg1: i32, %arg2: memref<1x8x16x4xf32, #tpu.memory_space<vmem>>, %arg3: memref<1x1x16x4xf32, #tpu.memory_space<vmem>>, %arg4: memref<1x1x16x4xf32, #tpu.memory_space<vmem>>, %arg5: memref<4x2xf32, #tpu.memory_space<vmem>>, %arg6: memref<1x2xf32, #tpu.memory_space<vmem>>, %arg7: memref<9x2x4xf32, #tpu.memory_space<vmem>>, %arg8: memref<1x4xf32, #tpu.memory_space<vmem>>, %arg9: memref<1x8x16x4xf32, #tpu.memory_space<vmem>>, %arg10: memref<3x10x16x2xf32, #tpu.memory_space<vmem>>, %arg11: memref<128x4xf32, #tpu.memory_space<vmem>>) attributes {dimension_semantics = [#tpu.dimension_semantics<parallel>, #tpu.dimension_semantics<parallel>], iteration_bounds = array<i64: 2, 2>, scalar_prefetch = 0 : i64, scratch_operands = 2 : i64, tpu.core_type = #tpu.core_type<tc>, window_params = [{transform_indices = @transform_0, window_bounds = array<i64: 1, 8, 16, 4>}, {transform_indices = @transform_1, window_bounds = array<i64: 1, 1, 16, 4>}, {transform_indices = @transform_2, window_bounds = array<i64: 1, 1, 16, 4>}, {pipeline_mode = #tpu.pipeline_mode<synchronous>, transform_indices = @transform_3, window_bounds = array<i64: 4, 2>}, {pipeline_mode = #tpu.pipeline_mode<synchronous>, transform_indices = @transform_4, window_bounds = array<i64: 1, 2>}, {pipeline_mode = #tpu.pipeline_mode<synchronous>, transform_indices = @transform_5, window_bounds = array<i64: 9, 2, 4>}, {pipeline_mode = #tpu.pipeline_mode<synchronous>, transform_indices = @transform_6, window_bounds = array<i64: 1, 4>}, {transform_indices = @transform_7, window_bounds = array<i64: 1, 8, 16, 4>}]} {
    %c0 = arith.constant 0 : index
    %c0_0 = arith.constant 0 : index
    %c0_1 = arith.constant 0 : index
    %c0_2 = arith.constant 0 : index
    %0 = vector.load %arg3[%c0, %c0_0, %c0_1, %c0_2] : memref<1x1x16x4xf32, #tpu.memory_space<vmem>>, vector<1x1x16x4xf32>
    %1 = vector.shape_cast %0 : vector<1x1x16x4xf32> to vector<16x4xf32>
    %c0_3 = arith.constant 0 : index
    %c0_4 = arith.constant 0 : index
    %c0_5 = arith.constant 0 : index
    %c0_6 = arith.constant 0 : index
    %2 = vector.load %arg2[%c0_3, %c0_4, %c0_5, %c0_6] : memref<1x8x16x4xf32, #tpu.memory_space<vmem>>, vector<1x8x16x4xf32>
    %3 = vector.shape_cast %2 : vector<1x8x16x4xf32> to vector<8x16x4xf32>
    %4 = vector.shape_cast %3 : vector<8x16x4xf32> to vector<128x4xf32>
    %c0_7 = arith.constant 0 : index
    %c0_8 = arith.constant 0 : index
    %c0_9 = arith.constant 0 : index
    %c0_10 = arith.constant 0 : index
    %5 = vector.load %arg4[%c0_7, %c0_8, %c0_9, %c0_10] : memref<1x1x16x4xf32, #tpu.memory_space<vmem>>, vector<1x1x16x4xf32>
    %6 = vector.shape_cast %5 : vector<1x1x16x4xf32> to vector<16x4xf32>
    %7 = tpu.concatenate %1, %4, %6 in 0 : vector<16x4xf32>, vector<128x4xf32>, vector<16x4xf32> -> vector<160x4xf32>
    %c0_11 = arith.constant 0 : index
    %c0_12 = arith.constant 0 : index
    %8 = vector.load %arg5[%c0_11, %c0_12] : memref<4x2xf32, #tpu.memory_space<vmem>>, vector<4x2xf32>
    %cst = arith.constant dense<0.000000e+00> : vector<160x2xf32>
    %9 = tpu.matmul %7, %8, %cst {dimension_numbers = #tpu.dot_dimension_numbers<[1], [0], [0], [1], [0, 0, 1, 1], [], []>} : vector<160x4xf32>, vector<4x2xf32>, vector<160x2xf32> -> vector<160x2xf32>
    %c0_13 = arith.constant 0 : index
    %c0_14 = arith.constant 0 : index
    %10 = vector.load %arg6[%c0_13, %c0_14] : memref<1x2xf32, #tpu.memory_space<vmem>>, vector<1x2xf32>
    %11 = vector.broadcast %10 : vector<1x2xf32> to vector<160x2xf32>
    %12 = arith.addf %9, %11 : vector<160x2xf32>
    %cst_15 = arith.constant 1.000000e-01 : f32
    %13 = vector.broadcast %cst_15 : f32 to vector<160x2xf32>
    %14 = arith.mulf %13, %12 : vector<160x2xf32>
    %15 = arith.maximumf %12, %14 : vector<160x2xf32>
    %16 = tpu.iota {dimensions = array<i32: 1>} : vector<10x16x1xi32>
    %17 = vector.shape_cast %15 : vector<160x2xf32> to vector<10x16x2xf32>
    %c1_i32 = arith.constant 1 : i32
    %18 = tpu.dynamic_rotate %15 by %c1_i32 dim 0 : vector<160x2xf32>, i32 -> vector<160x2xf32>
    %19 = vector.shape_cast %18 : vector<160x2xf32> to vector<10x16x2xf32>
    %c0_i32 = arith.constant 0 : i32
    %20 = vector.broadcast %c0_i32 : i32 to vector<10x16x1xi32>
    %21 = arith.cmpi eq, %16, %20 : vector<10x16x1xi32>
    %cst_16 = arith.constant 0.000000e+00 : f32
    %22 = vector.shape_cast %21 : vector<10x16x1xi1> to vector<10x16x1xi1>
    %23 = vector.broadcast %22 : vector<10x16x1xi1> to vector<10x16x2xi1>
    %24 = vector.broadcast %cst_16 : f32 to vector<10x16x2xf32>
    %25 = arith.select %23, %24, %19 : vector<10x16x2xi1>, vector<10x16x2xf32>
    %c159_i32 = arith.constant 159 : i32
    %26 = tpu.dynamic_rotate %15 by %c159_i32 dim 0 : vector<160x2xf32>, i32 -> vector<160x2xf32>
    %27 = vector.shape_cast %26 : vector<160x2xf32> to vector<10x16x2xf32>
    %c15_i32 = arith.constant 15 : i32
    %28 = vector.broadcast %c15_i32 : i32 to vector<10x16x1xi32>
    %29 = arith.cmpi eq, %16, %28 : vector<10x16x1xi32>
    %cst_17 = arith.constant 0.000000e+00 : f32
    %30 = vector.shape_cast %29 : vector<10x16x1xi1> to vector<10x16x1xi1>
    %31 = vector.broadcast %30 : vector<10x16x1xi1> to vector<10x16x2xi1>
    %32 = vector.broadcast %cst_17 : f32 to vector<10x16x2xf32>
    %33 = arith.select %31, %32, %27 : vector<10x16x2xi1>, vector<10x16x2xf32>
    %c0_18 = arith.constant 0 : index
    %c0_19 = arith.constant 0 : index
    %c0_20 = arith.constant 0 : index
    %c0_21 = arith.constant 0 : index
    %34 = vector.load %arg10[%c0_18, %c0_19, %c0_20, %c0_21] : memref<3x10x16x2xf32, #tpu.memory_space<vmem>>, vector<1x10x16x2xf32>
    %35 = vector.shape_cast %34 : vector<1x10x16x2xf32> to vector<10x16x2xf32>
    %36 = vector.shape_cast %25 : vector<10x16x2xf32> to vector<1x10x16x2xf32>
    tpu.vector_store %arg10[%c0_18, %c0_19, %c0_20, %c0_21], %36 {strides = array<i32>} : memref<3x10x16x2xf32, #tpu.memory_space<vmem>>, vector<1x10x16x2xf32>,
    %c1 = arith.constant 1 : index
    %c0_22 = arith.constant 0 : index
    %c0_23 = arith.constant 0 : index
    %c0_24 = arith.constant 0 : index
    %37 = vector.load %arg10[%c1, %c0_22, %c0_23, %c0_24] : memref<3x10x16x2xf32, #tpu.memory_space<vmem>>, vector<1x10x16x2xf32>
    %38 = vector.shape_cast %37 : vector<1x10x16x2xf32> to vector<10x16x2xf32>
    %39 = vector.shape_cast %17 : vector<10x16x2xf32> to vector<1x10x16x2xf32>
    tpu.vector_store %arg10[%c1, %c0_22, %c0_23, %c0_24], %39 {strides = array<i32>} : memref<3x10x16x2xf32, #tpu.memory_space<vmem>>, vector<1x10x16x2xf32>,
    %c2 = arith.constant 2 : index
    %c0_25 = arith.constant 0 : index
    %c0_26 = arith.constant 0 : index
    %c0_27 = arith.constant 0 : index
    %40 = vector.load %arg10[%c2, %c0_25, %c0_26, %c0_27] : memref<3x10x16x2xf32, #tpu.memory_space<vmem>>, vector<1x10x16x2xf32>
    %41 = vector.shape_cast %40 : vector<1x10x16x2xf32> to vector<10x16x2xf32>
    %42 = vector.shape_cast %33 : vector<10x16x2xf32> to vector<1x10x16x2xf32>
    tpu.vector_store %arg10[%c2, %c0_25, %c0_26, %c0_27], %42 {strides = array<i32>} : memref<3x10x16x2xf32, #tpu.memory_space<vmem>>, vector<1x10x16x2xf32>,
    %c0_i32_28 = arith.constant 0 : i32
    %43 = arith.cmpi eq, %arg1, %c0_i32_28 : i32
    %44 = arith.extui %43 : i1 to i32
    %c0_i32_29 = arith.constant 0 : i32
    %45 = arith.cmpi ne, %44, %c0_i32_29 : i32
    scf.if %45 {
      %cst_145 = arith.constant 0.000000e+00 : f32
      %143 = vector.broadcast %cst_145 : f32 to vector<16x2xf32>
      %c0_146 = arith.constant 0 : index
      %c0_147 = arith.constant 0 : index
      %c0_148 = arith.constant 0 : index
      %c0_149 = arith.constant 0 : index
      %144 = vector.load %arg10[%c0_146, %c0_147, %c0_148, %c0_149] : memref<3x10x16x2xf32, #tpu.memory_space<vmem>>, vector<1x1x16x2xf32>
      %145 = vector.shape_cast %144 : vector<1x1x16x2xf32> to vector<16x2xf32>
      %146 = vector.shape_cast %143 : vector<16x2xf32> to vector<1x1x16x2xf32>
      tpu.vector_store %arg10[%c0_146, %c0_147, %c0_148, %c0_149], %146 {strides = array<i32>} : memref<3x10x16x2xf32, #tpu.memory_space<vmem>>, vector<1x1x16x2xf32>,
      %cst_150 = arith.constant 0.000000e+00 : f32
      %147 = vector.broadcast %cst_150 : f32 to vector<16x2xf32>
      %c1_151 = arith.constant 1 : index
      %c0_152 = arith.constant 0 : index
      %c0_153 = arith.constant 0 : index
      %c0_154 = arith.constant 0 : index
      %148 = vector.load %arg10[%c1_151, %c0_152, %c0_153, %c0_154] : memref<3x10x16x2xf32, #tpu.memory_space<vmem>>, vector<1x1x16x2xf32>
      %149 = vector.shape_cast %148 : vector<1x1x16x2xf32> to vector<16x2xf32>
      %150 = vector.shape_cast %147 : vector<16x2xf32> to vector<1x1x16x2xf32>
      tpu.vector_store %arg10[%c1_151, %c0_152, %c0_153, %c0_154], %150 {strides = array<i32>} : memref<3x10x16x2xf32, #tpu.memory_space<vmem>>, vector<1x1x16x2xf32>,
      %cst_155 = arith.constant 0.000000e+00 : f32
      %151 = vector.broadcast %cst_155 : f32 to vector<16x2xf32>
      %c2_156 = arith.constant 2 : index
      %c0_157 = arith.constant 0 : index
      %c0_158 = arith.constant 0 : index
      %c0_159 = arith.constant 0 : index
      %152 = vector.load %arg10[%c2_156, %c0_157, %c0_158, %c0_159] : memref<3x10x16x2xf32, #tpu.memory_space<vmem>>, vector<1x1x16x2xf32>
      %153 = vector.shape_cast %152 : vector<1x1x16x2xf32> to vector<16x2xf32>
      %154 = vector.shape_cast %151 : vector<16x2xf32> to vector<1x1x16x2xf32>
      tpu.vector_store %arg10[%c2_156, %c0_157, %c0_158, %c0_159], %154 {strides = array<i32>} : memref<3x10x16x2xf32, #tpu.memory_space<vmem>>, vector<1x1x16x2xf32>,
    } else {
    }
    %c1_i32_30 = arith.constant 1 : i32
    %46 = arith.cmpi eq, %arg1, %c1_i32_30 : i32
    %47 = arith.extui %46 : i1 to i32
    %c0_i32_31 = arith.constant 0 : i32
    %48 = arith.cmpi ne, %47, %c0_i32_31 : i32
    scf.if %48 {
      %cst_145 = arith.constant 0.000000e+00 : f32
      %143 = vector.broadcast %cst_145 : f32 to vector<16x2xf32>
      %c0_146 = arith.constant 0 : index
      %c9 = arith.constant 9 : index
      %c0_147 = arith.constant 0 : index
      %c0_148 = arith.constant 0 : index
      %144 = vector.load %arg10[%c0_146, %c9, %c0_147, %c0_148] : memref<3x10x16x2xf32, #tpu.memory_space<vmem>>, vector<1x1x16x2xf32>
      %145 = vector.shape_cast %144 : vector<1x1x16x2xf32> to vector<16x2xf32>
      %146 = vector.shape_cast %143 : vector<16x2xf32> to vector<1x1x16x2xf32>
      tpu.vector_store %arg10[%c0_146, %c9, %c0_147, %c0_148], %146 {strides = array<i32>} : memref<3x10x16x2xf32, #tpu.memory_space<vmem>>, vector<1x1x16x2xf32>,
      %cst_149 = arith.constant 0.000000e+00 : f32
      %147 = vector.broadcast %cst_149 : f32 to vector<16x2xf32>
      %c1_150 = arith.constant 1 : index
      %c9_151 = arith.constant 9 : index
      %c0_152 = arith.constant 0 : index
      %c0_153 = arith.constant 0 : index
      %148 = vector.load %arg10[%c1_150, %c9_151, %c0_152, %c0_153] : memref<3x10x16x2xf32, #tpu.memory_space<vmem>>, vector<1x1x16x2xf32>
      %149 = vector.shape_cast %148 : vector<1x1x16x2xf32> to vector<16x2xf32>
      %150 = vector.shape_cast %147 : vector<16x2xf32> to vector<1x1x16x2xf32>
      tpu.vector_store %arg10[%c1_150, %c9_151, %c0_152, %c0_153], %150 {strides = array<i32>} : memref<3x10x16x2xf32, #tpu.memory_space<vmem>>, vector<1x1x16x2xf32>,
      %cst_154 = arith.constant 0.000000e+00 : f32
      %151 = vector.broadcast %cst_154 : f32 to vector<16x2xf32>
      %c2_155 = arith.constant 2 : index
      %c9_156 = arith.constant 9 : index
      %c0_157 = arith.constant 0 : index
      %c0_158 = arith.constant 0 : index
      %152 = vector.load %arg10[%c2_155, %c9_156, %c0_157, %c0_158] : memref<3x10x16x2xf32, #tpu.memory_space<vmem>>, vector<1x1x16x2xf32>
      %153 = vector.shape_cast %152 : vector<1x1x16x2xf32> to vector<16x2xf32>
      %154 = vector.shape_cast %151 : vector<16x2xf32> to vector<1x1x16x2xf32>
      tpu.vector_store %arg10[%c2_155, %c9_156, %c0_157, %c0_158], %154 {strides = array<i32>} : memref<3x10x16x2xf32, #tpu.memory_space<vmem>>, vector<1x1x16x2xf32>,
    } else {
    }
    %c0_32 = arith.constant 0 : index
    %c0_33 = arith.constant 0 : index
    %c0_34 = arith.constant 0 : index
    %c0_35 = arith.constant 0 : index
    %49 = vector.load %arg10[%c0_32, %c0_33, %c0_34, %c0_35] : memref<3x10x16x2xf32, #tpu.memory_space<vmem>>, vector<1x8x16x2xf32>
    %50 = vector.shape_cast %49 : vector<1x8x16x2xf32> to vector<8x16x2xf32>
    %51 = vector.shape_cast %50 : vector<8x16x2xf32> to vector<128x2xf32>
    %c0_36 = arith.constant 0 : index
    %c0_37 = arith.constant 0 : index
    %c0_38 = arith.constant 0 : index
    %52 = vector.load %arg7[%c0_36, %c0_37, %c0_38] : memref<9x2x4xf32, #tpu.memory_space<vmem>>, vector<1x2x4xf32>
    %53 = vector.shape_cast %52 : vector<1x2x4xf32> to vector<2x4xf32>
    %cst_39 = arith.constant dense<0.000000e+00> : vector<128x4xf32>
    %54 = tpu.matmul %51, %53, %cst_39 {dimension_numbers = #tpu.dot_dimension_numbers<[1], [0], [0], [1], [0, 0, 1, 1], [], []>} : vector<128x2xf32>, vector<2x4xf32>, vector<128x4xf32> -> vector<128x4xf32>
    %c0_40 = arith.constant 0 : index
    %c0_41 = arith.constant 0 : index
    %55 = vector.load %arg11[%c0_40, %c0_41] : memref<128x4xf32, #tpu.memory_space<vmem>>, vector<128x4xf32>
    tpu.vector_store %arg11[%c0_40, %c0_41], %54 {strides = array<i32>} : memref<128x4xf32, #tpu.memory_space<vmem>>, vector<128x4xf32>,
    %c1_42 = arith.constant 1 : index
    %c0_43 = arith.constant 0 : index
    %c0_44 = arith.constant 0 : index
    %c0_45 = arith.constant 0 : index
    %56 = vector.load %arg10[%c1_42, %c0_43, %c0_44, %c0_45] : memref<3x10x16x2xf32, #tpu.memory_space<vmem>>, vector<1x8x16x2xf32>
    %57 = vector.shape_cast %56 : vector<1x8x16x2xf32> to vector<8x16x2xf32>
    %58 = vector.shape_cast %57 : vector<8x16x2xf32> to vector<128x2xf32>
    %c1_46 = arith.constant 1 : index
    %c0_47 = arith.constant 0 : index
    %c0_48 = arith.constant 0 : index
    %59 = vector.load %arg7[%c1_46, %c0_47, %c0_48] : memref<9x2x4xf32, #tpu.memory_space<vmem>>, vector<1x2x4xf32>
    %60 = vector.shape_cast %59 : vector<1x2x4xf32> to vector<2x4xf32>
    %cst_49 = arith.constant dense<0.000000e+00> : vector<128x4xf32>
    %61 = tpu.matmul %58, %60, %cst_49 {dimension_numbers = #tpu.dot_dimension_numbers<[1], [0], [0], [1], [0, 0, 1, 1], [], []>} : vector<128x2xf32>, vector<2x4xf32>, vector<128x4xf32> -> vector<128x4xf32>
    %c0_50 = arith.constant 0 : index
    %c0_51 = arith.constant 0 : index
    %62 = vector.load %arg11[%c0_50, %c0_51] : memref<128x4xf32, #tpu.memory_space<vmem>>, vector<128x4xf32>
    %63 = arith.addf %62, %61 : vector<128x4xf32>
    %c0_52 = arith.constant 0 : index
    %c0_53 = arith.constant 0 : index
    %64 = vector.load %arg11[%c0_52, %c0_53] : memref<128x4xf32, #tpu.memory_space<vmem>>, vector<128x4xf32>
    tpu.vector_store %arg11[%c0_52, %c0_53], %63 {strides = array<i32>} : memref<128x4xf32, #tpu.memory_space<vmem>>, vector<128x4xf32>,
    %c2_54 = arith.constant 2 : index
    %c0_55 = arith.constant 0 : index
    %c0_56 = arith.constant 0 : index
    %c0_57 = arith.constant 0 : index
    %65 = vector.load %arg10[%c2_54, %c0_55, %c0_56, %c0_57] : memref<3x10x16x2xf32, #tpu.memory_space<vmem>>, vector<1x8x16x2xf32>
    %66 = vector.shape_cast %65 : vector<1x8x16x2xf32> to vector<8x16x2xf32>
    %67 = vector.shape_cast %66 : vector<8x16x2xf32> to vector<128x2xf32>
    %c2_58 = arith.constant 2 : index
    %c0_59 = arith.constant 0 : index
    %c0_60 = arith.constant 0 : index
    %68 = vector.load %arg7[%c2_58, %c0_59, %c0_60] : memref<9x2x4xf32, #tpu.memory_space<vmem>>, vector<1x2x4xf32>
    %69 = vector.shape_cast %68 : vector<1x2x4xf32> to vector<2x4xf32>
    %cst_61 = arith.constant dense<0.000000e+00> : vector<128x4xf32>
    %70 = tpu.matmul %67, %69, %cst_61 {dimension_numbers = #tpu.dot_dimension_numbers<[1], [0], [0], [1], [0, 0, 1, 1], [], []>} : vector<128x2xf32>, vector<2x4xf32>, vector<128x4xf32> -> vector<128x4xf32>
    %c0_62 = arith.constant 0 : index
    %c0_63 = arith.constant 0 : index
    %71 = vector.load %arg11[%c0_62, %c0_63] : memref<128x4xf32, #tpu.memory_space<vmem>>, vector<128x4xf32>
    %72 = arith.addf %71, %70 : vector<128x4xf32>
    %c0_64 = arith.constant 0 : index
    %c0_65 = arith.constant 0 : index
    %73 = vector.load %arg11[%c0_64, %c0_65] : memref<128x4xf32, #tpu.memory_space<vmem>>, vector<128x4xf32>
    tpu.vector_store %arg11[%c0_64, %c0_65], %72 {strides = array<i32>} : memref<128x4xf32, #tpu.memory_space<vmem>>, vector<128x4xf32>,
    %c0_66 = arith.constant 0 : index
    %c1_67 = arith.constant 1 : index
    %c0_68 = arith.constant 0 : index
    %c0_69 = arith.constant 0 : index
    %74 = vector.load %arg10[%c0_66, %c1_67, %c0_68, %c0_69] : memref<3x10x16x2xf32, #tpu.memory_space<vmem>>, vector<1x8x16x2xf32>
    %75 = vector.shape_cast %74 : vector<1x8x16x2xf32> to vector<8x16x2xf32>
    %76 = vector.shape_cast %75 : vector<8x16x2xf32> to vector<128x2xf32>
    %c3 = arith.constant 3 : index
    %c0_70 = arith.constant 0 : index
    %c0_71 = arith.constant 0 : index
    %77 = vector.load %arg7[%c3, %c0_70, %c0_71] : memref<9x2x4xf32, #tpu.memory_space<vmem>>, vector<1x2x4xf32>
    %78 = vector.shape_cast %77 : vector<1x2x4xf32> to vector<2x4xf32>
    %cst_72 = arith.constant dense<0.000000e+00> : vector<128x4xf32>
    %79 = tpu.matmul %76, %78, %cst_72 {dimension_numbers = #tpu.dot_dimension_numbers<[1], [0], [0], [1], [0, 0, 1, 1], [], []>} : vector<128x2xf32>, vector<2x4xf32>, vector<128x4xf32> -> vector<128x4xf32>
    %c0_73 = arith.constant 0 : index
    %c0_74 = arith.constant 0 : index
    %80 = vector.load %arg11[%c0_73, %c0_74] : memref<128x4xf32, #tpu.memory_space<vmem>>, vector<128x4xf32>
    %81 = arith.addf %80, %79 : vector<128x4xf32>
    %c0_75 = arith.constant 0 : index
    %c0_76 = arith.constant 0 : index
    %82 = vector.load %arg11[%c0_75, %c0_76] : memref<128x4xf32, #tpu.memory_space<vmem>>, vector<128x4xf32>
    tpu.vector_store %arg11[%c0_75, %c0_76], %81 {strides = array<i32>} : memref<128x4xf32, #tpu.memory_space<vmem>>, vector<128x4xf32>,
    %c1_77 = arith.constant 1 : index
    %c1_78 = arith.constant 1 : index
    %c0_79 = arith.constant 0 : index
    %c0_80 = arith.constant 0 : index
    %83 = vector.load %arg10[%c1_77, %c1_78, %c0_79, %c0_80] : memref<3x10x16x2xf32, #tpu.memory_space<vmem>>, vector<1x8x16x2xf32>
    %84 = vector.shape_cast %83 : vector<1x8x16x2xf32> to vector<8x16x2xf32>
    %85 = vector.shape_cast %84 : vector<8x16x2xf32> to vector<128x2xf32>
    %c4 = arith.constant 4 : index
    %c0_81 = arith.constant 0 : index
    %c0_82 = arith.constant 0 : index
    %86 = vector.load %arg7[%c4, %c0_81, %c0_82] : memref<9x2x4xf32, #tpu.memory_space<vmem>>, vector<1x2x4xf32>
    %87 = vector.shape_cast %86 : vector<1x2x4xf32> to vector<2x4xf32>
    %cst_83 = arith.constant dense<0.000000e+00> : vector<128x4xf32>
    %88 = tpu.matmul %85, %87, %cst_83 {dimension_numbers = #tpu.dot_dimension_numbers<[1], [0], [0], [1], [0, 0, 1, 1], [], []>} : vector<128x2xf32>, vector<2x4xf32>, vector<128x4xf32> -> vector<128x4xf32>
    %c0_84 = arith.constant 0 : index
    %c0_85 = arith.constant 0 : index
    %89 = vector.load %arg11[%c0_84, %c0_85] : memref<128x4xf32, #tpu.memory_space<vmem>>, vector<128x4xf32>
    %90 = arith.addf %89, %88 : vector<128x4xf32>
    %c0_86 = arith.constant 0 : index
    %c0_87 = arith.constant 0 : index
    %91 = vector.load %arg11[%c0_86, %c0_87] : memref<128x4xf32, #tpu.memory_space<vmem>>, vector<128x4xf32>
    tpu.vector_store %arg11[%c0_86, %c0_87], %90 {strides = array<i32>} : memref<128x4xf32, #tpu.memory_space<vmem>>, vector<128x4xf32>,
    %c2_88 = arith.constant 2 : index
    %c1_89 = arith.constant 1 : index
    %c0_90 = arith.constant 0 : index
    %c0_91 = arith.constant 0 : index
    %92 = vector.load %arg10[%c2_88, %c1_89, %c0_90, %c0_91] : memref<3x10x16x2xf32, #tpu.memory_space<vmem>>, vector<1x8x16x2xf32>
    %93 = vector.shape_cast %92 : vector<1x8x16x2xf32> to vector<8x16x2xf32>
    %94 = vector.shape_cast %93 : vector<8x16x2xf32> to vector<128x2xf32>
    %c5 = arith.constant 5 : index
    %c0_92 = arith.constant 0 : index
    %c0_93 = arith.constant 0 : index
    %95 = vector.load %arg7[%c5, %c0_92, %c0_93] : memref<9x2x4xf32, #tpu.memory_space<vmem>>, vector<1x2x4xf32>
    %96 = vector.shape_cast %95 : vector<1x2x4xf32> to vector<2x4xf32>
    %cst_94 = arith.constant dense<0.000000e+00> : vector<128x4xf32>
    %97 = tpu.matmul %94, %96, %cst_94 {dimension_numbers = #tpu.dot_dimension_numbers<[1], [0], [0], [1], [0, 0, 1, 1], [], []>} : vector<128x2xf32>, vector<2x4xf32>, vector<128x4xf32> -> vector<128x4xf32>
    %c0_95 = arith.constant 0 : index
    %c0_96 = arith.constant 0 : index
    %98 = vector.load %arg11[%c0_95, %c0_96] : memref<128x4xf32, #tpu.memory_space<vmem>>, vector<128x4xf32>
    %99 = arith.addf %98, %97 : vector<128x4xf32>
    %c0_97 = arith.constant 0 : index
    %c0_98 = arith.constant 0 : index
    %100 = vector.load %arg11[%c0_97, %c0_98] : memref<128x4xf32, #tpu.memory_space<vmem>>, vector<128x4xf32>
    tpu.vector_store %arg11[%c0_97, %c0_98], %99 {strides = array<i32>} : memref<128x4xf32, #tpu.memory_space<vmem>>, vector<128x4xf32>,
    %c0_99 = arith.constant 0 : index
    %c2_100 = arith.constant 2 : index
    %c0_101 = arith.constant 0 : index
    %c0_102 = arith.constant 0 : index
    %101 = vector.load %arg10[%c0_99, %c2_100, %c0_101, %c0_102] : memref<3x10x16x2xf32, #tpu.memory_space<vmem>>, vector<1x8x16x2xf32>
    %102 = vector.shape_cast %101 : vector<1x8x16x2xf32> to vector<8x16x2xf32>
    %103 = vector.shape_cast %102 : vector<8x16x2xf32> to vector<128x2xf32>
    %c6 = arith.constant 6 : index
    %c0_103 = arith.constant 0 : index
    %c0_104 = arith.constant 0 : index
    %104 = vector.load %arg7[%c6, %c0_103, %c0_104] : memref<9x2x4xf32, #tpu.memory_space<vmem>>, vector<1x2x4xf32>
    %105 = vector.shape_cast %104 : vector<1x2x4xf32> to vector<2x4xf32>
    %cst_105 = arith.constant dense<0.000000e+00> : vector<128x4xf32>
    %106 = tpu.matmul %103, %105, %cst_105 {dimension_numbers = #tpu.dot_dimension_numbers<[1], [0], [0], [1], [0, 0, 1, 1], [], []>} : vector<128x2xf32>, vector<2x4xf32>, vector<128x4xf32> -> vector<128x4xf32>
    %c0_106 = arith.constant 0 : index
    %c0_107 = arith.constant 0 : index
    %107 = vector.load %arg11[%c0_106, %c0_107] : memref<128x4xf32, #tpu.memory_space<vmem>>, vector<128x4xf32>
    %108 = arith.addf %107, %106 : vector<128x4xf32>
    %c0_108 = arith.constant 0 : index
    %c0_109 = arith.constant 0 : index
    %109 = vector.load %arg11[%c0_108, %c0_109] : memref<128x4xf32, #tpu.memory_space<vmem>>, vector<128x4xf32>
    tpu.vector_store %arg11[%c0_108, %c0_109], %108 {strides = array<i32>} : memref<128x4xf32, #tpu.memory_space<vmem>>, vector<128x4xf32>,
    %c1_110 = arith.constant 1 : index
    %c2_111 = arith.constant 2 : index
    %c0_112 = arith.constant 0 : index
    %c0_113 = arith.constant 0 : index
    %110 = vector.load %arg10[%c1_110, %c2_111, %c0_112, %c0_113] : memref<3x10x16x2xf32, #tpu.memory_space<vmem>>, vector<1x8x16x2xf32>
    %111 = vector.shape_cast %110 : vector<1x8x16x2xf32> to vector<8x16x2xf32>
    %112 = vector.shape_cast %111 : vector<8x16x2xf32> to vector<128x2xf32>
    %c7 = arith.constant 7 : index
    %c0_114 = arith.constant 0 : index
    %c0_115 = arith.constant 0 : index
    %113 = vector.load %arg7[%c7, %c0_114, %c0_115] : memref<9x2x4xf32, #tpu.memory_space<vmem>>, vector<1x2x4xf32>
    %114 = vector.shape_cast %113 : vector<1x2x4xf32> to vector<2x4xf32>
    %cst_116 = arith.constant dense<0.000000e+00> : vector<128x4xf32>
    %115 = tpu.matmul %112, %114, %cst_116 {dimension_numbers = #tpu.dot_dimension_numbers<[1], [0], [0], [1], [0, 0, 1, 1], [], []>} : vector<128x2xf32>, vector<2x4xf32>, vector<128x4xf32> -> vector<128x4xf32>
    %c0_117 = arith.constant 0 : index
    %c0_118 = arith.constant 0 : index
    %116 = vector.load %arg11[%c0_117, %c0_118] : memref<128x4xf32, #tpu.memory_space<vmem>>, vector<128x4xf32>
    %117 = arith.addf %116, %115 : vector<128x4xf32>
    %c0_119 = arith.constant 0 : index
    %c0_120 = arith.constant 0 : index
    %118 = vector.load %arg11[%c0_119, %c0_120] : memref<128x4xf32, #tpu.memory_space<vmem>>, vector<128x4xf32>
    tpu.vector_store %arg11[%c0_119, %c0_120], %117 {strides = array<i32>} : memref<128x4xf32, #tpu.memory_space<vmem>>, vector<128x4xf32>,
    %c2_121 = arith.constant 2 : index
    %c2_122 = arith.constant 2 : index
    %c0_123 = arith.constant 0 : index
    %c0_124 = arith.constant 0 : index
    %119 = vector.load %arg10[%c2_121, %c2_122, %c0_123, %c0_124] : memref<3x10x16x2xf32, #tpu.memory_space<vmem>>, vector<1x8x16x2xf32>
    %120 = vector.shape_cast %119 : vector<1x8x16x2xf32> to vector<8x16x2xf32>
    %121 = vector.shape_cast %120 : vector<8x16x2xf32> to vector<128x2xf32>
    %c8 = arith.constant 8 : index
    %c0_125 = arith.constant 0 : index
    %c0_126 = arith.constant 0 : index
    %122 = vector.load %arg7[%c8, %c0_125, %c0_126] : memref<9x2x4xf32, #tpu.memory_space<vmem>>, vector<1x2x4xf32>
    %123 = vector.shape_cast %122 : vector<1x2x4xf32> to vector<2x4xf32>
    %cst_127 = arith.constant dense<0.000000e+00> : vector<128x4xf32>
    %124 = tpu.matmul %121, %123, %cst_127 {dimension_numbers = #tpu.dot_dimension_numbers<[1], [0], [0], [1], [0, 0, 1, 1], [], []>} : vector<128x2xf32>, vector<2x4xf32>, vector<128x4xf32> -> vector<128x4xf32>
    %c0_128 = arith.constant 0 : index
    %c0_129 = arith.constant 0 : index
    %125 = vector.load %arg11[%c0_128, %c0_129] : memref<128x4xf32, #tpu.memory_space<vmem>>, vector<128x4xf32>
    %126 = arith.addf %125, %124 : vector<128x4xf32>
    %c0_130 = arith.constant 0 : index
    %c0_131 = arith.constant 0 : index
    %127 = vector.load %arg11[%c0_130, %c0_131] : memref<128x4xf32, #tpu.memory_space<vmem>>, vector<128x4xf32>
    tpu.vector_store %arg11[%c0_130, %c0_131], %126 {strides = array<i32>} : memref<128x4xf32, #tpu.memory_space<vmem>>, vector<128x4xf32>,
    %c0_132 = arith.constant 0 : index
    %c0_133 = arith.constant 0 : index
    %128 = vector.load %arg11[%c0_132, %c0_133] : memref<128x4xf32, #tpu.memory_space<vmem>>, vector<128x4xf32>
    %129 = vector.shape_cast %128 : vector<128x4xf32> to vector<8x16x4xf32>
    %c0_134 = arith.constant 0 : index
    %c0_135 = arith.constant 0 : index
    %130 = vector.load %arg8[%c0_134, %c0_135] : memref<1x4xf32, #tpu.memory_space<vmem>>, vector<1x4xf32>
    %131 = vector.shape_cast %130 : vector<1x4xf32> to vector<1x1x4xf32>
    %132 = vector.broadcast %131 : vector<1x1x4xf32> to vector<8x16x4xf32>
    %133 = arith.addf %129, %132 : vector<8x16x4xf32>
    %cst_136 = arith.constant 1.000000e-01 : f32
    %134 = vector.broadcast %cst_136 : f32 to vector<8x16x4xf32>
    %135 = arith.mulf %134, %133 : vector<8x16x4xf32>
    %136 = arith.maximumf %133, %135 : vector<8x16x4xf32>
    %c0_137 = arith.constant 0 : index
    %c0_138 = arith.constant 0 : index
    %c0_139 = arith.constant 0 : index
    %c0_140 = arith.constant 0 : index
    %137 = vector.load %arg2[%c0_137, %c0_138, %c0_139, %c0_140] : memref<1x8x16x4xf32, #tpu.memory_space<vmem>>, vector<1x8x16x4xf32>
    %138 = vector.shape_cast %137 : vector<1x8x16x4xf32> to vector<8x16x4xf32>
    %139 = arith.addf %136, %138 : vector<8x16x4xf32>
    %c0_141 = arith.constant 0 : index
    %c0_142 = arith.constant 0 : index
    %c0_143 = arith.constant 0 : index
    %c0_144 = arith.constant 0 : index
    %140 = vector.load %arg9[%c0_141, %c0_142, %c0_143, %c0_144] : memref<1x8x16x4xf32, #tpu.memory_space<vmem>>, vector<1x8x16x4xf32>
    %141 = vector.shape_cast %140 : vector<1x8x16x4xf32> to vector<8x16x4xf32>
    %142 = vector.shape_cast %139 : vector<8x16x4xf32> to vector<1x8x16x4xf32>
    tpu.vector_store %arg9[%c0_141, %c0_142, %c0_143, %c0_144], %142 {strides = array<i32>} : memref<1x8x16x4xf32, #tpu.memory_space<vmem>>, vector<1x8x16x4xf32>,
    return
  }
  func.func @transform_0(%arg0: i32, %arg1: i32) -> (i32, i32, i32, i32) {
    %c0_i32 = arith.constant 0 : i32
    %c0_i32_0 = arith.constant 0 : i32
    %c0_i32_1 = arith.constant 0 : i32
    return %arg0, %arg1, %c0_i32, %c0_i32_0 : i32, i32, i32, i32
  }
  func.func @transform_1(%arg0: i32, %arg1: i32) -> (i32, i32, i32, i32) {
    %c8_i32 = arith.constant 8 : i32
    %0 = arith.muli %arg1, %c8_i32 : i32
    %c1_i32 = arith.constant 1 : i32
    %1 = arith.subi %0, %c1_i32 : i32
    %c0_i32 = arith.constant 0 : i32
    %2 = arith.maxsi %1, %c0_i32 : i32
    %c0_i32_0 = arith.constant 0 : i32
    %c0_i32_1 = arith.constant 0 : i32
    %c0_i32_2 = arith.constant 0 : i32
    return %arg0, %2, %c0_i32_0, %c0_i32_1 : i32, i32, i32, i32
  }
  func.func @transform_2(%arg0: i32, %arg1: i32) -> (i32, i32, i32, i32) {
    %c8_i32 = arith.constant 8 : i32
    %0 = arith.muli %arg1, %c8_i32 : i32
    %c8_i32_0 = arith.constant 8 : i32
    %1 = arith.addi %0, %c8_i32_0 : i32
    %c15_i32 = arith.constant 15 : i32
    %2 = arith.minsi %1, %c15_i32 : i32
    %c0_i32 = arith.constant 0 : i32
    %c0_i32_1 = arith.constant 0 : i32
    %c0_i32_2 = arith.constant 0 : i32
    return %arg0, %2, %c0_i32, %c0_i32_1 : i32, i32, i32, i32
  }
  func.func @transform_3(%arg0: i32, %arg1: i32) -> (i32, i32) {
    %c0_i32 = arith.constant 0 : i32
    %c0_i32_0 = arith.constant 0 : i32
    %c0_i32_1 = arith.constant 0 : i32
    return %c0_i32, %c0_i32_0 : i32, i32
  }
  func.func @transform_4(%arg0: i32, %arg1: i32) -> (i32, i32) {
    %c0_i32 = arith.constant 0 : i32
    %c0_i32_0 = arith.constant 0 : i32
    %c0_i32_1 = arith.constant 0 : i32
    return %c0_i32, %c0_i32_0 : i32, i32
  }
  func.func @transform_5(%arg0: i32, %arg1: i32) -> (i32, i32, i32) {
    %c0_i32 = arith.constant 0 : i32
    %c0_i32_0 = arith.constant 0 : i32
    %c0_i32_1 = arith.constant 0 : i32
    %c0_i32_2 = arith.constant 0 : i32
    return %c0_i32, %c0_i32_0, %c0_i32_1 : i32, i32, i32
  }
  func.func @transform_6(%arg0: i32, %arg1: i32) -> (i32, i32) {
    %c0_i32 = arith.constant 0 : i32
    %c0_i32_0 = arith.constant 0 : i32
    %c0_i32_1 = arith.constant 0 : i32
    return %c0_i32, %c0_i32_0 : i32, i32
  }
  func.func @transform_7(%arg0: i32, %arg1: i32) -> (i32, i32, i32, i32) {
    %c0_i32 = arith.constant 0 : i32
    %c0_i32_0 = arith.constant 0 : i32
    %c0_i32_1 = arith.constant 0 : i32
    return %arg0, %arg1, %c0_i32, %c0_i32_0 : i32, i32, i32, i32
  }
}

</mosaic_0001>

<bundles_post_ra>
// kernel: residual_block_forward.2
= control target key start
LH: loop header
LB: loop body
LE: loop exit
PB: predicated region body
PF: predicated region fallthrough
CT: control target
= control target key end

     0   :  { %s4352_s24 = smov 0   ;;  %s4354_s25 = smov 0   ;;  %s5503_s0 = inlined_call_operand.vmem [shape: f32[2,16,16,4], index: 0, kind: input, shape index: {}, may-alias: {0,1,2}]   ;;  %s5504_s1 = inlined_call_operand.vmem [shape: f32[2,16,16,4], index: 1, kind: input, shape index: {}, may-alias: {0,1,2}]   ;;  %s5505_s2 = inlined_call_operand.vmem [shape: f32[2,16,16,4], index: 2, kind: input, shape index: {}, may-alias: {0,1,2}]   ;;  %s5506_s3 = inlined_call_operand.vmem [shape: f32[4,2], index: 3, kind: input, shape index: {}]   ;;  %s5507_s4 = inlined_call_operand.vmem [shape: f32[1,2], index: 4, kind: input, shape index: {}]   ;;  %s5508_s5 = inlined_call_operand.vmem [shape: f32[9,2,4], index: 5, kind: input, shape index: {}]   ;;  %s5509_s6 = inlined_call_operand.vmem [shape: f32[1,4], index: 6, kind: input, shape index: {}]   ;;  %s5510_s7 = inlined_call_operand.vmem [shape: f32[2,16,16,4], index: 7, kind: output, shape index: {}]  }
   0x1   :  { %s4356_s26 = smov 0   ;;  %s4358_s27 = smov 0  }
   0x2   :  { %s4360_s28 = smov 0  }
   0x3 LB: > { %s26_s29 = sadd.s32 1, %s4300_s26  ;;  %s29_s30 = sadd.s32 1, %s4304_s27  ;;  %s4308_s28 = sphi %s4360_s28, %s17_s28   ;;  %s4304_s27 = sphi %s4358_s27, %s5514_s27   ;;  %s4300_s26 = sphi %s4356_s26, %s5513_s26   ;;  %s4296_s25 = sphi %s4354_s25, %s5512_s25   ;;  %s4292_s24 = sphi %s4352_s24, %s5511_s24  }
   0x4   : > { %p27_p0 = scmp.ge.s32.totalorder %s26_s29, 2  ;;  %p3570_p1 = scmp.ge.s32.totalorder %s4308_s28, 1 }
   0x5   : > { %p323_p2 = scmp.lt.s32.totalorder %s4308_s28, 5 }
   0x6   : > { %s5516_s29 = smov (%p27_p0, %s26_s29), 0  ;;  %s5518_s30 = smov (!%p27_p0, %s29_s30), %s4304_s27 }
   0x7   : > { %p324_p3 = pnand %p3570_p1, %p323_p2  ;;  %p31_p4 = scmp.ge.s32.totalorder %s5518_s30, 2 }
   0x8   : > { %v467_v0 = vld [vmem:[%s5506_s3] sm:$0xf] (!%p324_p3)  ;;  %vm536_vm0 = vcmask (!%p324_p3), 1043456   ;;  %s3571_s10 = sshll.u32 (!%p324_p3), %s4292_s24, 3  ;;  %p392_p5 = scmp.lt.s32.totalorder (!%p324_p3), %s4296_s25, 1  ;;  %vm475_vm1 = vcmask (!%p324_p3), 31744   ;;  %v745_v21 = vlaneseq (!%p324_p3) }
   0x9   : > { %s5520_s30 = smov (%p31_p4, %s5518_s30), 0  ;;  %327 = sbr.rel (%p324_p3) target bundleno = 702 (0x2be), region = 48 }
   0xa   : > { %3960 = vmatprep.subr.msk.mxu0 (!%p324_p3), %vm536_vm0, %v467_v0  ;;  %4226 = vmatprep.subr.msk.mxu1 (!%p324_p3), %vm536_vm0, %v467_v0  ;;  %p394_p6 = scmp.lt.s32.totalorder (!%p324_p3), %s3571_s10, 15  ;;  %s3576_s11 = sadd.s32 (!%p324_p3), 4294967295, %s3571_s10  ;;  %v4443_v22 = vld [vmem:[%s5507_s4] ss:$0 sm:$0xff] (!%p324_p3)  ;;  %v4445_v23 = vshrl.u32 (!%p324_p3), %v745_v21, 7  ;;  %vm882_vm2 = vcmask (!%p324_p3), 15360  }
   0xb   : > { %3961 = vmatpush3.msk.msra.mxu0 (!%p324_p3), %vm536_vm0, %v467_v0  ;;  %4227 = vmatpush3.msk.msra.mxu1 (!%p324_p3), %vm536_vm0, %v467_v0  ;;  %p404_p7 = scmp.gt.s32.totalorder (!%p324_p3), %s3576_s11, 0  ;;  %p3577_p8 = scmp.lt.s32.totalorder (!%p324_p3), %s3576_s11, 15 }
   0xc   : > { %s420_s16 = sadd.s32 (!%p324_p3), 8, %s3571_s10  ;;  %v4451_v30 = vadd.s32 (!%p324_p3), 8, %v4445_v23  ;;  %vm768_vm3 = vcmp.lt.s32.totalorder (!%p324_p3), %v4445_v23, 1  ;;  %vm835_vm4 = vcmp.lt.s32.totalorder (!%p324_p3), %v4445_v23, 7  ;;  %vm789_vm5 = vcmp.eq.s32.totalorder (!%p324_p3), %v4445_v23, 0  ;;  %p3618_p10 = scmp.ne.s32.totalorder (!%p324_p3), %s4292_s24, 0 }
   0xd   : > { %p421_p9 = scmp.lt.s32.totalorder (!%p324_p3), %s420_s16, 15 }
   0xe   : > { %vm857_vm6 = vcmp.eq.s32.totalorder (!%p324_p3), %v4451_v30, 15 }
  0x10   : > { %s5522_s25 = smov (!%p392_p5, %s4296_s25), 1  ;;  %s5524_s11 = smov (!%p404_p7, %s3576_s11), 0 }
  0x11   : > { %s395_s12 = scalar_select %p394_p6, %s3571_s10, 15 }
  0x12   : > { %s3573_s13 = sshll.u32 %s5522_s25, 5  ;;  %s5526_s16 = smov (!%p421_p9, %s420_s16), 15 }
  0x13   : > { %s3572_s14 = sshll.u32 %s395_s12, 1  ;;  %s5528_s11 = smov (!%p3577_p8, %s5524_s11), 15 }
  0x14   : > { %s398_s15 = sadd.s32 %s3573_s13, %s3572_s14  ;;  %s5530_s16 = smov (!%p421_p9, %s5526_s16), 15 }
  0x15   : > { %s3574_s17 = sshll.u32 %s398_s15, 3  ;;  %s3582_s25 = sshll.u32 %s5528_s11, 1 }
  0x16   : > { %s4391_s20 = scalar_lea.vmem %s5510_s7, %s3574_s17  ;;  %s4396_s23 = scalar_lea.vmem %s5503_s0, %s3574_s17 }
  0x17   : > { %s412_s8 = sadd.s32 %s3582_s25, %s3573_s13  ;;  %s3589_s9 = sshll.u32 %s5530_s16, 1  ;;  %v449_v3 = vld [vmem:[%s4396_s23] sm:$0xff]  ;;  %v450_v6 = vld [vmem:[%s4396_s23 + $0x8] sm:$0xff]  ;;  %v451_v7 = vld [vmem:[%s4396_s23 + $0x10] sm:$0xff] }
  0x18   : > { %s3584_s10 = sshll.u32 %s412_s8, 3  ;;  %s429_s12 = sadd.s32 %s3589_s9, %s3573_s13  ;;  %v452_v8 = vld [vmem:[%s4396_s23 + $0x18] sm:$0xff]  ;;  %v453_v9 = vld [vmem:[%s4396_s23 + $0x20] sm:$0xff]  ;;  %v454_v10 = vld [vmem:[%s4396_s23 + $0x28] sm:$0xff] }
  0x19   : > { %s414_s18 = scalar_lea.vmem %s5504_s1, %s3584_s10  ;;  %s3591_s19 = sshll.u32 %s429_s12, 3  ;;  %v455_v11 = vld [vmem:[%s4396_s23 + $0x30] sm:$0xff]  ;;  %v456_v12 = vld [vmem:[%s4396_s23 + $0x38] sm:$0xff]  ;;  %v457_v13 = vld [vmem:[%s4396_s23 + $0x40] sm:$0xff] }
  0x1a   : > { %v447_v1 = vld [vmem:[%s414_s18] sm:$0xff]  ;;  %v448_v2 = vld [vmem:[%s414_s18 + $0x8] sm:$0xff]  ;;  %s431_s11 = scalar_lea.vmem %s5505_s2, %s3591_s19  ;;  %v459_v15 = vld [vmem:[%s4396_s23 + $0x50] sm:$0xff] }
  0x1b   : > { %3962 = vmatprep.mubr.msk.f32.mxu0 %vm475_vm1, %v447_v1  ;;  %v465_v4 = vld [vmem:[%s431_s11] sm:$0xff]  ;;  %v466_v5 = vld [vmem:[%s431_s11 + $0x8] sm:$0xff]  ;;  %v460_v16 = vld [vmem:[%s4396_s23 + $0x58] sm:$0xff] }
  0x1c   : > { %3963 = vmatmul.mubr.msk.f32.vlgmr.msra.gmra.mrb[0].mxu0 %vm475_vm1, %v448_v2  ;;  %3989 = vmatprep.mubr.msk.f32.mxu1 %vm475_vm1, %v465_v4  ;;  %v458_v14 = vld [vmem:[%s4396_s23 + $0x48] sm:$0xff]  ;;  %v461_v17 = vld [vmem:[%s4396_s23 + $0x60] sm:$0xff]  ;;  %v463_v19 = vld [vmem:[%s4396_s23 + $0x70] sm:$0xff] }
  0x1d   : > { %3990 = vmatmul.mubr.msk.f32.vlgmr.msra.gmra.mrb[0].mxu1 %vm475_vm1, %v466_v5  ;;  %3965 = vmatprep.mubr.msk.f32.mxu0 %vm475_vm1, %v449_v3  ;;  %v462_v18 = vld [vmem:[%s4396_s23 + $0x68] sm:$0xff]  ;;  %v464_v20 = vld [vmem:[%s4396_s23 + $0x78] sm:$0xff] }
  0x20   : > { %3966 = vmatmul.mubr.msk.f32.gmra.mrb[2].mxu0 %vm475_vm1, %v450_v6 }
  0x21   : > { %3968 = vmatprep.mubr.msk.f32.mxu0 %vm475_vm1, %v451_v7 }
  0x24   : > { %3969 = vmatmul.mubr.msk.f32.gmra.mrb[4].mxu0 %vm475_vm1, %v452_v8 }
  0x25   : > { %3971 = vmatprep.mubr.msk.f32.mxu0 %vm475_vm1, %v453_v9 }
  0x28   : > { %3972 = vmatmul.mubr.msk.f32.gmra.mrb[6].mxu0 %vm475_vm1, %v454_v10 }
  0x29   : > { %3974 = vmatprep.mubr.msk.f32.mxu0 %vm475_vm1, %v455_v11 }
  0x2c   : > { %3975 = vmatmul.mubr.msk.f32.gmra.mrb[8].mxu0 %vm475_vm1, %v456_v12 }
  0x2d   : > { %3977 = vmatprep.mubr.msk.f32.mxu0 %vm475_vm1, %v457_v13 }
  0x30   : > { %3978 = vmatmul.mubr.msk.f32.gmra.mrb[10].mxu0 %vm475_vm1, %v458_v14 }
  0x31   : > { %3980 = vmatprep.mubr.msk.f32.mxu0 %vm475_vm1, %v459_v15 }
  0x34   : > { %3981 = vmatmul.mubr.msk.f32.gmra.mrb[12].mxu0 %vm475_vm1, %v460_v16 }
  0x35   : > { %3983 = vmatprep.mubr.msk.f32.mxu0 %vm475_vm1, %v461_v17 }
  0x38   : > { %3984 = vmatmul.mubr.msk.f32.gmra.mrb[14].mxu0 %vm475_vm1, %v462_v18 }
  0x39   : > { %3986 = vmatprep.mubr.msk.f32.mxu0 %vm475_vm1, %v463_v19 }
  0x3c   : > { %3987 = vmatmul.mubr.msk.f32.gmra.mrb[16].mxu0 %vm475_vm1, %v464_v20 }
  0xef   : > { %v3964_v24 = vpop.f32.mrb[0].mxu0 }
  0xf0   : > { %v612_v25 = vadd.f32 %v3964_v24, %v4443_v22  ;;  %v606_v26 = vpop.f32.mrb[1].mxu0  ;;  %v3991_v27 = vpop.f32.mrb[0].mxu1 }
  0xf1   : > { %v607_v28 = vadd.f32 %v4443_v22, %v606_v26  ;;  %v702_v29 = vadd.f32 %v3991_v27, %v4443_v22  ;;  %v696_v31 = vpop.f32.mrb[1].mxu1 }
  0xf2   : > { %v706_v32 = vmul.f32 0.1, %v612_v25  ;;  %v697_v33 = vadd.f32 %v4443_v22, %v696_v31 }
  0xf3   : > { %v705_v34 = vmul.f32 0.1, %v607_v28  ;;  %v724_v35 = vmul.f32 0.1, %v702_v29  ;;  %v3967_v36 = vpop.f32.mrb[2].mxu0 }
  0xf4   : > { %v726_v37 = vmax.f32 %v612_v25, %v706_v32  ;;  %v622_v38 = vadd.f32 %v3967_v36, %v4443_v22  ;;  %v616_v39 = vpop.f32.mrb[3].mxu0  ;;  %v723_v40 = vmul.f32 0.1, %v697_v33 }
  0xf5   : > { %v725_v41 = vmax.f32 %v607_v28, %v705_v34  ;;  %v744_v42 = vmax.f32 %v702_v29, %v724_v35  ;;  %v617_v43 = vadd.f32 %v4443_v22, %v616_v39 }
  0xf6   : > { %v749_v44 = vrot.slane %v726_v37, 7  ;;  %v816_v45 = vrot.slane %v726_v37, 1  ;;  %905 = vst.msk [vmem:[#allocation2 + $0xa8] sm:$0xff] %vm882_vm2, %v726_v37  ;;  %v708_v46 = vmul.f32 0.1, %v622_v38  ;;  %v4461_v47 = vmax.f32 %v697_v33, %v723_v40 }
  0xf7   : > { %v748_v48 = vrot.slane %v725_v41, 7  ;;  %v815_v49 = vrot.slane %v725_v41, 1  ;;  %904 = vst.msk [vmem:[#allocation2 + $0xa0] sm:$0xff] %vm882_vm2, %v725_v41  ;;  %v767_v50 = vrot.slane %v744_v42, 7  ;;  %v834_v51 = vrot.slane %v744_v42, 1  ;;  %923 = vst.msk [vmem:[#allocation2 + $0x138] sm:$0xff] %vm882_vm2, %v744_v42 }
  0xf8   : > { %v3970_v52 = vpop.f32.mrb[4].mxu0  ;;  %v4465_v53 = vmax.f32 %v622_v38, %v708_v46  ;;  %v707_v54 = vmul.f32 0.1, %v617_v43  ;;  %v766_v57 = vrot.slane %v4461_v47, 7  ;;  %922 = vst.msk [vmem:[#allocation2 + $0x130] sm:$0xff] %vm882_vm2, %v4461_v47  ;;  %v833_v9 = vrot.slane %v4461_v47, 1 }
  0xf9   : > { %v632_v55 = vadd.f32 %v3970_v52, %v4443_v22  ;;  %v626_v56 = vpop.f32.mrb[5].mxu0  ;;  %v787_v58 = vsel %vm768_vm3, %v748_v48, %v749_v44  ;;  %v854_v59 = vsel %vm835_vm4, %v815_v49, %v816_v45  ;;  %v788_v60 = vsel %vm768_vm3, %v767_v50, %v748_v48 }
  0xfa   : > { %v855_v61 = vsel %vm835_vm4, %v834_v51, %v815_v49  ;;  %884 = vst.msk [vmem:[#allocation2 + $0x8] sm:$0xff] %vm882_vm2, %v787_v58  ;;  %925 = vst.msk [vmem:[#allocation2 + $0x140] sm:$0xff] %vm882_vm2, %v854_v59  ;;  %v795_v62 = vsel %vm789_vm5, 0.0, %v788_v60  ;;  %v751_v0 = vrot.slane %v4465_v53, 7  ;;  %v818_v1 = vrot.slane %v4465_v53, 1 }
  0xfb   : > { %v881_v63 = vsel %vm857_vm6, 0.0, %v855_v61  ;;  %907 = vst.msk [vmem:[#allocation2 + $0xb8] sm:$0xff] %vm882_vm2, %v4465_v53  ;;  %883 = vst.msk [vmem:[#allocation2] sm:$0xff] %vm882_vm2, %v795_v62  ;;  %v727_v2 = vmax.f32 %v617_v43, %v707_v54  ;;  %v710_v3 = vmul.f32 0.1, %v632_v55  ;;  %v627_v4 = vadd.f32 %v4443_v22, %v626_v56  ;;  %v3973_v5 = vpop.f32.mrb[6].mxu0 }
  0xfc   : > { %944 = vst.msk [vmem:[#allocation2 + $0x1d8] sm:$0xff] %vm882_vm2, %v881_v63  ;;  %v769_v6 = vsel %vm768_vm3, %v766_v57, %v767_v50  ;;  %v642_v7 = vadd.f32 %v3973_v5, %v4443_v22  ;;  %v636_v8 = vpop.f32.mrb[7].mxu0  ;;  %v836_v16 = vsel %vm835_vm4, %v833_v9, %v834_v51 }
  0xfd   : > { %902 = vst.msk [vmem:[#allocation2 + $0x98] sm:$0xff] %vm882_vm2, %v769_v6  ;;  %v750_v10 = vrot.slane %v727_v2, 7  ;;  %v817_v11 = vrot.slane %v727_v2, 1  ;;  %906 = vst.msk [vmem:[#allocation2 + $0xb0] sm:$0xff] %vm882_vm2, %v727_v2  ;;  %v730_v12 = vmax.f32 %v632_v55, %v710_v3  ;;  %v709_v13 = vmul.f32 0.1, %v627_v4 }
  0xfe   : > { %v712_v14 = vmul.f32 0.1, %v642_v7  ;;  %v637_v15 = vadd.f32 %v4443_v22, %v636_v8  ;;  %943 = vst.msk [vmem:[#allocation2 + $0x1d0] sm:$0xff] %vm882_vm2, %v836_v16 }
  0xff   : > { %v785_v17 = vsel %vm768_vm3, %v750_v10, %v751_v0  ;;  %v786_v18 = vsel %vm768_vm3, %v749_v44, %v750_v10  ;;  %v852_v19 = vsel %vm835_vm4, %v817_v11, %v818_v1  ;;  %v853_v20 = vsel %vm835_vm4, %v816_v45, %v817_v11  ;;  %909 = vst.msk [vmem:[#allocation2 + $0xc8] sm:$0xff] %vm882_vm2, %v730_v12  ;;  %v3976_v21 = vpop.f32.mrb[8].mxu0 }
 0x100   : > { %v797_v24 = vsel %vm789_vm5, 0.0, %v786_v18  ;;  %v863_v25 = vsel %vm857_vm6, 0.0, %v853_v20  ;;  %886 = vst.msk [vmem:[#allocation2 + $0x18] sm:$0xff] %vm882_vm2, %v785_v17  ;;  %927 = vst.msk [vmem:[#allocation2 + $0x150] sm:$0xff] %vm882_vm2, %v852_v19  ;;  %v753_v26 = vrot.slane %v730_v12, 7  ;;  %v820_v27 = vrot.slane %v730_v12, 1 }
 0x101   : > { %v646_v28 = vpop.f32.mrb[9].mxu0  ;;  %885 = vst.msk [vmem:[#allocation2 + $0x10] sm:$0xff] %vm882_vm2, %v797_v24  ;;  %926 = vst.msk [vmem:[#allocation2 + $0x148] sm:$0xff] %vm882_vm2, %v863_v25  ;;  %v729_v29 = vmax.f32 %v627_v4, %v709_v13  ;;  %v732_v31 = vmax.f32 %v642_v7, %v712_v14  ;;  %v711_v32 = vmul.f32 0.1, %v637_v15  ;;  %v652_v33 = vadd.f32 %v3976_v21, %v4443_v22 }
 0x102   : > { %v647_v34 = vadd.f32 %v4443_v22, %v646_v28 }
 0x103   : > { %v752_v35 = vrot.slane %v729_v29, 7  ;;  %v819_v36 = vrot.slane %v729_v29, 1  ;;  %908 = vst.msk [vmem:[#allocation2 + $0xc0] sm:$0xff] %vm882_vm2, %v729_v29  ;;  %v755_v37 = vrot.slane %v732_v31, 7  ;;  %v822_v38 = vrot.slane %v732_v31, 1  ;;  %911 = vst.msk [vmem:[#allocation2 + $0xd8] sm:$0xff] %vm882_vm2, %v732_v31 }
 0x104   : > { %v3979_v39 = vpop.f32.mrb[10].mxu0  ;;  %v731_v40 = vmax.f32 %v637_v15, %v711_v32  ;;  %v714_v41 = vmul.f32 0.1, %v652_v33  ;;  %v713_v42 = vmul.f32 0.1, %v647_v34 }
 0x105   : > { %v662_v43 = vadd.f32 %v3979_v39, %v4443_v22  ;;  %v656_v44 = vpop.f32.mrb[11].mxu0  ;;  %v783_v45 = vsel %vm768_vm3, %v752_v35, %v753_v26  ;;  %v784_v46 = vsel %vm768_vm3, %v751_v0, %v752_v35  ;;  %v850_v48 = vsel %vm835_vm4, %v819_v36, %v820_v27 }
 0x106   : > { %v851_v49 = vsel %vm835_vm4, %v818_v1, %v819_v36  ;;  %v799_v50 = vsel %vm789_vm5, 0.0, %v784_v46  ;;  %888 = vst.msk [vmem:[#allocation2 + $0x28] sm:$0xff] %vm882_vm2, %v783_v45  ;;  %929 = vst.msk [vmem:[#allocation2 + $0x160] sm:$0xff] %vm882_vm2, %v850_v48  ;;  %v754_v52 = vrot.slane %v731_v40, 7  ;;  %v821_v53 = vrot.slane %v731_v40, 1 }
 0x107   : > { %v865_v51 = vsel %vm857_vm6, 0.0, %v851_v49  ;;  %910 = vst.msk [vmem:[#allocation2 + $0xd0] sm:$0xff] %vm882_vm2, %v731_v40  ;;  %887 = vst.msk [vmem:[#allocation2 + $0x20] sm:$0xff] %vm882_vm2, %v799_v50  ;;  %v734_v54 = vmax.f32 %v652_v33, %v714_v41  ;;  %v733_v55 = vmax.f32 %v647_v34, %v713_v42  ;;  %v716_v56 = vmul.f32 0.1, %v662_v43  ;;  %v3982_v59 = vpop.f32.mrb[12].mxu0 }
 0x108   : > { %928 = vst.msk [vmem:[#allocation2 + $0x158] sm:$0xff] %vm882_vm2, %v865_v51  ;;  %v657_v58 = vadd.f32 %v4443_v22, %v656_v44  ;;  %v781_v60 = vsel %vm768_vm3, %v754_v52, %v755_v37  ;;  %v782_v61 = vsel %vm768_vm3, %v753_v26, %v754_v52  ;;  %v848_v62 = vsel %vm835_vm4, %v821_v53, %v822_v38  ;;  %v666_v0 = vpop.f32.mrb[13].mxu0 }
 0x109   : > { %v849_v63 = vsel %vm835_vm4, %v820_v27, %v821_v53  ;;  %v801_v1 = vsel %vm789_vm5, 0.0, %v782_v61  ;;  %890 = vst.msk [vmem:[#allocation2 + $0x38] sm:$0xff] %vm882_vm2, %v781_v60  ;;  %931 = vst.msk [vmem:[#allocation2 + $0x170] sm:$0xff] %vm882_vm2, %v848_v62  ;;  %v757_v3 = vrot.slane %v734_v54, 7  ;;  %v824_v4 = vrot.slane %v734_v54, 1 }
 0x10a   : > { %v867_v2 = vsel %vm857_vm6, 0.0, %v849_v63  ;;  %913 = vst.msk [vmem:[#allocation2 + $0xe8] sm:$0xff] %vm882_vm2, %v734_v54  ;;  %912 = vst.msk [vmem:[#allocation2 + $0xe0] sm:$0xff] %vm882_vm2, %v733_v55  ;;  %v756_v5 = vrot.slane %v733_v55, 7  ;;  %v823_v6 = vrot.slane %v733_v55, 1  ;;  %v736_v7 = vmax.f32 %v662_v43, %v716_v56 }
 0x10b   : > { %889 = vst.msk [vmem:[#allocation2 + $0x30] sm:$0xff] %vm882_vm2, %v801_v1  ;;  %930 = vst.msk [vmem:[#allocation2 + $0x168] sm:$0xff] %vm882_vm2, %v867_v2  ;;  %v715_v8 = vmul.f32 0.1, %v657_v58  ;;  %v672_v10 = vadd.f32 %v3982_v59, %v4443_v22  ;;  %v667_v11 = vadd.f32 %v4443_v22, %v666_v0  ;;  %v3985_v12 = vpop.f32.mrb[14].mxu0 }
 0x10c   : > { %v779_v13 = vsel %vm768_vm3, %v756_v5, %v757_v3  ;;  %v780_v14 = vsel %vm768_vm3, %v755_v37, %v756_v5  ;;  %v846_v15 = vsel %vm835_vm4, %v823_v6, %v824_v4  ;;  %v847_v16 = vsel %vm835_vm4, %v822_v38, %v823_v6  ;;  %915 = vst.msk [vmem:[#allocation2 + $0xf8] sm:$0xff] %vm882_vm2, %v736_v7  ;;  %v676_v17 = vpop.f32.mrb[15].mxu0 }
 0x10d   : > { %v803_v18 = vsel %vm789_vm5, 0.0, %v780_v14  ;;  %v869_v19 = vsel %vm857_vm6, 0.0, %v847_v16  ;;  %892 = vst.msk [vmem:[#allocation2 + $0x48] sm:$0xff] %vm882_vm2, %v779_v13  ;;  %933 = vst.msk [vmem:[#allocation2 + $0x180] sm:$0xff] %vm882_vm2, %v846_v15  ;;  %v759_v20 = vrot.slane %v736_v7, 7  ;;  %v826_v21 = vrot.slane %v736_v7, 1 }
 0x10e   : > { %891 = vst.msk [vmem:[#allocation2 + $0x40] sm:$0xff] %vm882_vm2, %v803_v18  ;;  %932 = vst.msk [vmem:[#allocation2 + $0x178] sm:$0xff] %vm882_vm2, %v869_v19  ;;  %v735_v24 = vmax.f32 %v657_v58, %v715_v8  ;;  %v718_v25 = vmul.f32 0.1, %v672_v10  ;;  %v717_v26 = vmul.f32 0.1, %v667_v11  ;;  %v682_v27 = vadd.f32 %v3985_v12, %v4443_v22 }
 0x10f   : > { %v677_v28 = vadd.f32 %v4443_v22, %v676_v17  ;;  %v3988_v29 = vpop.f32.mrb[16].mxu0 }
 0x110   : > { %v758_v31 = vrot.slane %v735_v24, 7  ;;  %v825_v32 = vrot.slane %v735_v24, 1  ;;  %914 = vst.msk [vmem:[#allocation2 + $0xf0] sm:$0xff] %vm882_vm2, %v735_v24  ;;  %v738_v33 = vmax.f32 %v672_v10, %v718_v25  ;;  %v737_v34 = vmax.f32 %v667_v11, %v717_v26  ;;  %v686_v35 = vpop.f32.mrb[17].mxu0 }
 0x111   : > { %v720_v36 = vmul.f32 0.1, %v682_v27  ;;  %v719_v37 = vmul.f32 0.1, %v677_v28  ;;  %v692_v38 = vadd.f32 %v3988_v29, %v4443_v22  ;;  %v687_v39 = vadd.f32 %v4443_v22, %v686_v35 }
 0x112   : > { %v777_v40 = vsel %vm768_vm3, %v758_v31, %v759_v20  ;;  %v778_v41 = vsel %vm768_vm3, %v757_v3, %v758_v31  ;;  %v844_v42 = vsel %vm835_vm4, %v825_v32, %v826_v21  ;;  %v845_v43 = vsel %vm835_vm4, %v824_v4, %v825_v32  ;;  %917 = vst.msk [vmem:[#allocation2 + $0x108] sm:$0xff] %vm882_vm2, %v738_v33 }
 0x113   : > { %916 = vst.msk [vmem:[#allocation2 + $0x100] sm:$0xff] %vm882_vm2, %v737_v34  ;;  %v805_v44 = vsel %vm789_vm5, 0.0, %v778_v41  ;;  %v871_v22 = vsel %vm857_vm6, 0.0, %v845_v43  ;;  %894 = vst.msk [vmem:[#allocation2 + $0x58] sm:$0xff] %vm882_vm2, %v777_v40  ;;  %v761_v45 = vrot.slane %v738_v33, 7  ;;  %v828_v46 = vrot.slane %v738_v33, 1 }
 0x114   : > { %935 = vst.msk [vmem:[#allocation2 + $0x190] sm:$0xff] %vm882_vm2, %v844_v42  ;;  %893 = vst.msk [vmem:[#allocation2 + $0x50] sm:$0xff] %vm882_vm2, %v805_v44  ;;  %v760_v48 = vrot.slane %v737_v34, 7  ;;  %v827_v49 = vrot.slane %v737_v34, 1  ;;  %v740_v50 = vmax.f32 %v682_v27, %v720_v36  ;;  %v739_v51 = vmax.f32 %v677_v28, %v719_v37 }
 0x115   : > { %934 = vst.msk [vmem:[#allocation2 + $0x188] sm:$0xff] %vm882_vm2, %v871_v22  ;;  %v722_v52 = vmul.f32 0.1, %v692_v38  ;;  %v721_v53 = vmul.f32 0.1, %v687_v39 }
 0x116   : > { %v775_v54 = vsel %vm768_vm3, %v760_v48, %v761_v45  ;;  %v776_v55 = vsel %vm768_vm3, %v759_v20, %v760_v48  ;;  %v842_v56 = vsel %vm835_vm4, %v827_v49, %v828_v46  ;;  %v843_v58 = vsel %vm835_vm4, %v826_v21, %v827_v49  ;;  %919 = vst.msk [vmem:[#allocation2 + $0x118] sm:$0xff] %vm882_vm2, %v740_v50 }
 0x117   : > { %918 = vst.msk [vmem:[#allocation2 + $0x110] sm:$0xff] %vm882_vm2, %v739_v51  ;;  %v807_v59 = vsel %vm789_vm5, 0.0, %v776_v55  ;;  %v873_v60 = vsel %vm857_vm6, 0.0, %v843_v58  ;;  %896 = vst.msk [vmem:[#allocation2 + $0x68] sm:$0xff] %vm882_vm2, %v775_v54  ;;  %v763_v61 = vrot.slane %v740_v50, 7  ;;  %v830_v62 = vrot.slane %v740_v50, 1 }
 0x118   : > { %937 = vst.msk [vmem:[#allocation2 + $0x1a0] sm:$0xff] %vm882_vm2, %v842_v56  ;;  %895 = vst.msk [vmem:[#allocation2 + $0x60] sm:$0xff] %vm882_vm2, %v807_v59  ;;  %v762_v63 = vrot.slane %v739_v51, 7  ;;  %v829_v0 = vrot.slane %v739_v51, 1  ;;  %v742_v1 = vmax.f32 %v692_v38, %v722_v52  ;;  %v741_v2 = vmax.f32 %v687_v39, %v721_v53 }
 0x119   : > { %936 = vst.msk [vmem:[#allocation2 + $0x198] sm:$0xff] %vm882_vm2, %v873_v60  ;;  %v4310_v21 = vmov (!%p3618_p10), 0.0  }
 0x11a   : > { %v773_v3 = vsel %vm768_vm3, %v762_v63, %v763_v61  ;;  %v774_v4 = vsel %vm768_vm3, %v761_v45, %v762_v63  ;;  %v840_v5 = vsel %vm835_vm4, %v829_v0, %v830_v62  ;;  %v841_v6 = vsel %vm835_vm4, %v828_v46, %v829_v0  ;;  %921 = vst.msk [vmem:[#allocation2 + $0x128] sm:$0xff] %vm882_vm2, %v742_v1 }
 0x11b   : > { %920 = vst.msk [vmem:[#allocation2 + $0x120] sm:$0xff] %vm882_vm2, %v741_v2  ;;  %v809_v7 = vsel %vm789_vm5, 0.0, %v774_v4  ;;  %v875_v8 = vsel %vm857_vm6, 0.0, %v841_v6  ;;  %898 = vst.msk [vmem:[#allocation2 + $0x78] sm:$0xff] %vm882_vm2, %v773_v3  ;;  %v765_v10 = vrot.slane %v742_v1, 7  ;;  %v832_v11 = vrot.slane %v742_v1, 1 }
 0x11c   : > { %939 = vst.msk [vmem:[#allocation2 + $0x1b0] sm:$0xff] %vm882_vm2, %v840_v5  ;;  %897 = vst.msk [vmem:[#allocation2 + $0x70] sm:$0xff] %vm882_vm2, %v809_v7  ;;  %v764_v12 = vrot.slane %v741_v2, 7  ;;  %v831_v13 = vrot.slane %v741_v2, 1  ;;  %948 = sbr.rel (%p3618_p10) target bundleno = 292 (0x124), region = 52 }
 0x11d   : > { %938 = vst.msk [vmem:[#allocation2 + $0x1a8] sm:$0xff] %vm882_vm2, %v875_v8  ;;  %v770_v14 = vsel %vm768_vm3, %v765_v10, %v766_v57  ;;  %v837_v15 = vsel %vm835_vm4, %v832_v11, %v833_v9  ;;  %949 = vst.msk [vmem:[#allocation2] sm:$0xff] (!%p3618_p10), %vm882_vm2, %v4310_v21 }
 0x11e   : > { %v813_v16 = vsel %vm789_vm5, 0.0, %v770_v14  ;;  %v879_v17 = vsel %vm857_vm6, 0.0, %v837_v15  ;;  %v771_v18 = vsel %vm768_vm3, %v764_v12, %v765_v10  ;;  %v772_v19 = vsel %vm768_vm3, %v763_v61, %v764_v12  ;;  %950 = vst.msk [vmem:[#allocation2 + $0x8] sm:$0xff] (!%p3618_p10), %vm882_vm2, %v4310_v21  ;;  %951 = vst.msk [vmem:[#allocation2 + $0xa0] sm:$0xff] (!%p3618_p10), %vm882_vm2, %v4310_v21 }
 0x11f   : > { %901 = vst.msk [vmem:[#allocation2 + $0x90] sm:$0xff] %vm882_vm2, %v813_v16  ;;  %942 = vst.msk [vmem:[#allocation2 + $0x1c8] sm:$0xff] %vm882_vm2, %v879_v17  ;;  %v811_v47 = vsel %vm789_vm5, 0.0, %v772_v19  ;;  %v838_v57 = vsel %vm835_vm4, %v831_v13, %v832_v11  ;;  %v839_v9 = vsel %vm835_vm4, %v830_v62, %v831_v13 }
 0x120   : > { %900 = vst.msk [vmem:[#allocation2 + $0x88] sm:$0xff] %vm882_vm2, %v771_v18  ;;  %v877_v20 = vsel %vm857_vm6, 0.0, %v839_v9  ;;  %899 = vst.msk [vmem:[#allocation2 + $0x80] sm:$0xff] %vm882_vm2, %v811_v47 }
 0x121   : > { %941 = vst.msk [vmem:[#allocation2 + $0x1c0] sm:$0xff] %vm882_vm2, %v838_v57  ;;  %940 = vst.msk [vmem:[#allocation2 + $0x1b8] sm:$0xff] %vm882_vm2, %v877_v20 }
 0x122   : > { %952 = vst.msk [vmem:[#allocation2 + $0xa8] sm:$0xff] (!%p3618_p10), %vm882_vm2, %v4310_v21  ;;  %953 = vst.msk [vmem:[#allocation2 + $0x140] sm:$0xff] (!%p3618_p10), %vm882_vm2, %v4310_v21 }
 0x123   : > { %954 = vst.msk [vmem:[#allocation2 + $0x148] sm:$0xff] %vm882_vm2, %v4310_v21 }
 0x124 PF: > { %p3619_p11 = scmp.ne.s32.totalorder %s4292_s24, 1 }
 0x125   : > { %v4311_v23 = vmov (!%p3619_p11), 0.0  }
 0x126   : > { %958 = sbr.rel (%p3619_p11) target bundleno = 301 (0x12d), region = 56  ;;  %960 = vst.msk [vmem:[#allocation2 + $0x90] sm:$0xff] (!%p3619_p11), %vm882_vm2, %v4311_v23  ;;  %961 = vst.msk [vmem:[#allocation2 + $0x98] sm:$0xff] (!%p3619_p11), %vm882_vm2, %v4311_v23 }
 0x127   : > { %963 = vst.msk [vmem:[#allocation2 + $0x130] sm:$0xff] (!%p3619_p11), %vm882_vm2, %v4311_v23  ;;  %964 = vst.msk [vmem:[#allocation2 + $0x138] sm:$0xff] (!%p3619_p11), %vm882_vm2, %v4311_v23 }
 0x128   : > { %966 = vst.msk [vmem:[#allocation2 + $0x1d0] sm:$0xff] (!%p3619_p11), %vm882_vm2, %v4311_v23  ;;  %967 = vst.msk [vmem:[#allocation2 + $0x1d8] sm:$0xff] (!%p3619_p11), %vm882_vm2, %v4311_v23 }
 0x12d PF: > { %v984_v30 = vld [vmem:[%s5508_s5] sm:$0x3]  ;;  %vm1033_vm7 = vcmask 1041408   ;;  %v969_v25 = vld [vmem:[#allocation2 + $0x8] sm:$0xff]  ;;  %v3637_v26 = vld [vmem:[%s5508_s5 + $0x2] sm:$0x3] }
 0x12e   : > { %v968_v24 = vld [vmem:[#allocation2] sm:$0xff]  ;;  %3992 = vmatprep.subr.msk.mxu1 %vm1033_vm7, %v984_v30  ;;  %v4694_v27 = vld [vmem:[#allocation2 + $0x10] sm:$0xff]  ;;  %v4702_v28 = vld [vmem:[#allocation2 + $0x18] sm:$0xff] }
 0x12f   : > { %3994 = vmatprep.mubr.msk.f32.mxu1 %vm882_vm2, %v968_v24  ;;  %3993 = vmatpush3.msk.msra.mxu1 %vm1033_vm7, %v984_v30  ;;  %v4704_v29 = vld [vmem:[#allocation2 + $0x20] sm:$0xff]  ;;  %v4717_v32 = vld [vmem:[#allocation2 + $0x28] sm:$0xff]  ;;  %v4722_v35 = vld [vmem:[#allocation2 + $0x30] sm:$0xff] }
 0x130   : > { %3995 = vmatmul.mubr.msk.f32.vlgmr.msra.gmra.mrb[2].mxu1 %vm882_vm2, %v969_v25  ;;  %4018 = vmatprep.subr.msk.mxu1 %vm1033_vm7, %v3637_v26  ;;  %v4709_v31 = vld [vmem:[%s5508_s5 + $0x6] sm:$0x3]  ;;  %v3655_v33 = vld [vmem:[%s5508_s5 + $0x4] sm:$0x3]  ;;  %v1461_v36 = vld [vmem:[#allocation2 + $0x148] sm:$0xff] }
 0x131   : > { %4019 = vmatpush3.msk.msra.mxu1 %vm1033_vm7, %v3637_v26  ;;  %3997 = vmatprep.mubr.msk.f32.mxu1 %vm882_vm2, %v4694_v27  ;;  %v1460_v34 = vld [vmem:[#allocation2 + $0x140] sm:$0xff]  ;;  %v3691_v37 = vld [vmem:[%s5508_s5 + $0x8] sm:$0x3]  ;;  %v4730_v38 = vld [vmem:[#allocation2 + $0x150] sm:$0xff] }
 0x132   : > { %4070 = vmatprep.subr.msk.mxu1 %vm1033_vm7, %v4709_v31  ;;  %4044 = vmatprep.subr.msk.mxu0 %vm1033_vm7, %v3655_v33  ;;  %v4737_v39 = vld [vmem:[#allocation2 + $0x38] sm:$0xff]  ;;  %v4742_v41 = vld [vmem:[#allocation2 + $0x40] sm:$0xff]  ;;  %v4755_v43 = vld [vmem:[#allocation2 + $0x48] sm:$0xff] }
 0x133   : > { %4046 = vmatprep.mubr.msk.f32.mxu0 %vm882_vm2, %v1460_v34  ;;  %4045 = vmatpush3.msk.msra.mxu0 %vm1033_vm7, %v3655_v33  ;;  %v4740_v40 = vld [vmem:[#allocation2 + $0x158] sm:$0xff]  ;;  %v4747_v42 = vld [vmem:[#allocation2 + $0x160] sm:$0xff]  ;;  %v4759_v44 = vld [vmem:[#allocation2 + $0x168] sm:$0xff] }
 0x134   : > { %3998 = vmatmul.mubr.msk.f32.gmra.mrb[4].mxu1 %vm882_vm2, %v4702_v28  ;;  %4047 = vmatmul.mubr.msk.f32.vlgmr.msra.gmra.mrb[18].mxu0 %vm882_vm2, %v1461_v36  ;;  %v4761_v22 = vld [vmem:[#allocation2 + $0x50] sm:$0xff]  ;;  %v3727_v46 = vld [vmem:[%s5508_s5 + $0xc] sm:$0x3]  ;;  %v4774_v48 = vld [vmem:[#allocation2 + $0x58] sm:$0xff] }
 0x135   : > { %4000 = vmatprep.mubr.msk.f32.mxu1 %vm882_vm2, %v4704_v29  ;;  %4096 = vmatprep.subr.msk.mxu0 %vm1033_vm7, %v3691_v37  ;;  %v4763_v45 = vld [vmem:[#allocation2 + $0x170] sm:$0xff]  ;;  %v4778_v49 = vld [vmem:[#allocation2 + $0x178] sm:$0xff]  ;;  %v4780_v50 = vld [vmem:[#allocation2 + $0x60] sm:$0xff] }
 0x136   : > { %4097 = vmatpush3.msk.msra.mxu0 %vm1033_vm7, %v3691_v37  ;;  %4049 = vmatprep.mubr.msk.f32.mxu0 %vm882_vm2, %v4730_v38  ;;  %v4782_v51 = vld [vmem:[#allocation2 + $0x180] sm:$0xff]  ;;  %v4791_v52 = vld [vmem:[#allocation2 + $0x68] sm:$0xff]  ;;  %v4797_v54 = vld [vmem:[#allocation2 + $0x70] sm:$0xff] }
 0x137   : > { %4148 = vmatprep.subr.msk.mxu0 %vm1033_vm7, %v3727_v46  ;;  %v4795_v53 = vld [vmem:[#allocation2 + $0x188] sm:$0xff]  ;;  %v4799_v55 = vld [vmem:[#allocation2 + $0x190] sm:$0xff]  ;;  %v4807_v56 = vld [vmem:[#allocation2 + $0x78] sm:$0xff] }
 0x138   : > { %4001 = vmatmul.mubr.msk.f32.gmra.mrb[6].mxu1 %vm882_vm2, %v4717_v32  ;;  %4050 = vmatmul.mubr.msk.f32.gmra.mrb[20].mxu0 %vm882_vm2, %v4740_v40  ;;  %v4811_v58 = vld [vmem:[#allocation2 + $0x198] sm:$0xff]  ;;  %v1198_v59 = vld [vmem:[#allocation2 + $0xa0] sm:$0xff]  ;;  %v1199_v61 = vld [vmem:[#allocation2 + $0xa8] sm:$0xff] }
 0x139   : > { %4003 = vmatprep.mubr.msk.f32.mxu1 %vm882_vm2, %v4722_v35  ;;  %4052 = vmatprep.mubr.msk.f32.mxu0 %vm882_vm2, %v4747_v42  ;;  %v4813_v60 = vld [vmem:[#allocation2 + $0x1a0] sm:$0xff]  ;;  %v4822_v62 = vld [vmem:[#allocation2 + $0x1a8] sm:$0xff]  ;;  %v1200_v63 = vld [vmem:[#allocation2 + $0xb0] sm:$0xff] }
 0x13a   : > { %v3709_v0 = vld [vmem:[%s5508_s5 + $0xa] sm:$0x3]  ;;  %v4827_v1 = vld [vmem:[#allocation2 + $0x1b0] sm:$0xff]  ;;  %v1201_v2 = vld [vmem:[#allocation2 + $0xb8] sm:$0xff] }
 0x13b   : > { %v4835_v3 = vld [vmem:[#allocation2 + $0x1b8] sm:$0xff]  ;;  %v4837_v4 = vld [vmem:[#allocation2 + $0xc0] sm:$0xff]  ;;  %v4847_v5 = vld [vmem:[#allocation2 + $0xc8] sm:$0xff] }
 0x13c   : > { %4004 = vmatmul.mubr.msk.f32.gmra.mrb[8].mxu1 %vm882_vm2, %v4737_v39  ;;  %4053 = vmatmul.mubr.msk.f32.gmra.mrb[22].mxu0 %vm882_vm2, %v4759_v44  ;;  %v4850_v6 = vld [vmem:[#allocation2 + $0xd0] sm:$0xff]  ;;  %v4860_v8 = vld [vmem:[#allocation2 + $0xd8] sm:$0xff]  ;;  %v4863_v10 = vld [vmem:[#allocation2 + $0xe0] sm:$0xff] }
 0x13d   : > { %4006 = vmatprep.mubr.msk.f32.mxu1 %vm882_vm2, %v4742_v41  ;;  %4055 = vmatprep.mubr.msk.f32.mxu0 %vm882_vm2, %v4763_v45  ;;  %v3763_v7 = vld [vmem:[%s5508_s5 + $0x10] sm:$0x3]  ;;  %v4874_v11 = vld [vmem:[#allocation2 + $0xe8] sm:$0xff]  ;;  %v4886_v13 = vld [vmem:[#allocation2 + $0xf8] sm:$0xff] }
 0x13e   : > { %v4878_v12 = vld [vmem:[#allocation2 + $0xf0] sm:$0xff]  ;;  %v4890_v14 = vld [vmem:[#allocation2 + $0x100] sm:$0xff]  ;;  %v4898_v15 = vld [vmem:[#allocation2 + $0x108] sm:$0xff] }
 0x13f   : > { %v4902_v16 = vld [vmem:[#allocation2 + $0x110] sm:$0xff]  ;;  %v4910_v17 = vld [vmem:[#allocation2 + $0x118] sm:$0xff]  ;;  %v3745_v18 = vld [vmem:[%s5508_s5 + $0xe] sm:$0x3] }
 0x140   : > { %4007 = vmatmul.mubr.msk.f32.gmra.mrb[10].mxu1 %vm882_vm2, %v4755_v43  ;;  %4056 = vmatmul.mubr.msk.f32.gmra.mrb[24].mxu0 %vm882_vm2, %v4778_v49  ;;  %v4925_v19 = vld [vmem:[#allocation2 + $0x120] sm:$0xff]  ;;  %v4934_v47 = vld [vmem:[#allocation2 + $0x128] sm:$0xff]  ;;  %v2526_v20 = vld [vmem:[#allocation2 + $0x90] sm:$0xff] }
 0x141   : > { %4009 = vmatprep.mubr.msk.f32.mxu1 %vm882_vm2, %v4761_v22  ;;  %4058 = vmatprep.mubr.msk.f32.mxu0 %vm882_vm2, %v4782_v51  ;;  %v1737_v57 = vld [vmem:[#allocation2 + $0x80] sm:$0xff]  ;;  %v1738_v9 = vld [vmem:[#allocation2 + $0x88] sm:$0xff]  ;;  %v2527_v21 = vld [vmem:[#allocation2 + $0x98] sm:$0xff] }
 0x142   : > { %v2263_v23 = vld [vmem:[#allocation2 + $0x1c0] sm:$0xff]  ;;  %v2264_v30 = vld [vmem:[#allocation2 + $0x1c8] sm:$0xff]  ;;  %v3052_v24 = vld [vmem:[#allocation2 + $0x1d0] sm:$0xff] }
 0x143   : > { %v3053_v25 = vld [vmem:[#allocation2 + $0x1d8] sm:$0xff]  ;;  %v2789_v26 = vld [vmem:[#allocation2 + $0x130] sm:$0xff] }
 0x144   : > { %4010 = vmatmul.mubr.msk.f32.gmra.mrb[12].mxu1 %vm882_vm2, %v4774_v48  ;;  %4059 = vmatmul.mubr.msk.f32.gmra.mrb[26].mxu0 %vm882_vm2, %v4795_v53 }
 0x145   : > { %4012 = vmatprep.mubr.msk.f32.mxu1 %vm882_vm2, %v4780_v50  ;;  %4061 = vmatprep.mubr.msk.f32.mxu0 %vm882_vm2, %v4799_v55 }
 0x148   : > { %4013 = vmatmul.mubr.msk.f32.gmra.mrb[14].mxu1 %vm882_vm2, %v4791_v52  ;;  %4062 = vmatmul.mubr.msk.f32.gmra.mrb[28].mxu0 %vm882_vm2, %v4811_v58 }
 0x149   : > { %4015 = vmatprep.mubr.msk.f32.mxu1 %vm882_vm2, %v4797_v54  ;;  %4064 = vmatprep.mubr.msk.f32.mxu0 %vm882_vm2, %v4813_v60 }
 0x14c   : > { %4016 = vmatmul.mubr.msk.f32.gmra.mrb[16].mxu1 %vm882_vm2, %v4807_v56  ;;  %4065 = vmatmul.mubr.msk.f32.gmra.mrb[30].mxu0 %vm882_vm2, %v4822_v62 }
 0x14d   : > { %4020 = vmatprep.mubr.msk.f32.mxu1 %vm882_vm2, %v1198_v59  ;;  %4067 = vmatprep.mubr.msk.f32.mxu0 %vm882_vm2, %v4827_v1 }
 0x150   : > { %4021 = vmatmul.mubr.msk.f32.vlgmr.msra.gmra.mrb[18].mxu1 %vm882_vm2, %v1199_v61  ;;  %4068 = vmatmul.mubr.msk.f32.gmra.mrb[32].mxu0 %vm882_vm2, %v4835_v3 }
 0x151   : > { %4071 = vmatpush3.msk.msra.mxu1 %vm1033_vm7, %v4709_v31  ;;  %4023 = vmatprep.mubr.msk.f32.mxu1 %vm882_vm2, %v1200_v63 }
 0x152   : > { %4122 = vmatprep.subr.msk.mxu1 %vm1033_vm7, %v3709_v0  ;;  %4098 = vmatprep.mubr.msk.f32.mxu0 %vm882_vm2, %v1200_v63 }
 0x154   : > { %4024 = vmatmul.mubr.msk.f32.gmra.mrb[20].mxu1 %vm882_vm2, %v1201_v2  ;;  %4099 = vmatmul.mubr.msk.f32.vlgmr.msra.gmra.mrb[34].mxu0 %vm882_vm2, %v1201_v2 }
 0x155   : > { %4026 = vmatprep.mubr.msk.f32.mxu1 %vm882_vm2, %v4837_v4  ;;  %4149 = vmatpush3.msk.msra.mxu0 %vm1033_vm7, %v3727_v46 }
 0x156   : > { %4101 = vmatprep.mubr.msk.f32.mxu0 %vm882_vm2, %v4837_v4  ;;  %4200 = vmatprep.subr.msk.mxu0 %vm1033_vm7, %v3763_v7 }
 0x158   : > { %4027 = vmatmul.mubr.msk.f32.gmra.mrb[22].mxu1 %vm882_vm2, %v4847_v5  ;;  %4102 = vmatmul.mubr.msk.f32.gmra.mrb[36].mxu0 %vm882_vm2, %v4847_v5 }
 0x159   : > { %4029 = vmatprep.mubr.msk.f32.mxu1 %vm882_vm2, %v4850_v6  ;;  %4104 = vmatprep.mubr.msk.f32.mxu0 %vm882_vm2, %v4850_v6 }
 0x15c   : > { %4030 = vmatmul.mubr.msk.f32.gmra.mrb[24].mxu1 %vm882_vm2, %v4860_v8  ;;  %4105 = vmatmul.mubr.msk.f32.gmra.mrb[38].mxu0 %vm882_vm2, %v4860_v8 }
 0x15d   : > { %4032 = vmatprep.mubr.msk.f32.mxu1 %vm882_vm2, %v4863_v10  ;;  %4107 = vmatprep.mubr.msk.f32.mxu0 %vm882_vm2, %v4863_v10 }
 0x160   : > { %4033 = vmatmul.mubr.msk.f32.gmra.mrb[26].mxu1 %vm882_vm2, %v4874_v11  ;;  %4108 = vmatmul.mubr.msk.f32.gmra.mrb[40].mxu0 %vm882_vm2, %v4874_v11 }
 0x161   : > { %4035 = vmatprep.mubr.msk.f32.mxu1 %vm882_vm2, %v4878_v12  ;;  %4110 = vmatprep.mubr.msk.f32.mxu0 %vm882_vm2, %v4878_v12 }
 0x164   : > { %4036 = vmatmul.mubr.msk.f32.gmra.mrb[28].mxu1 %vm882_vm2, %v4886_v13  ;;  %4111 = vmatmul.mubr.msk.f32.gmra.mrb[42].mxu0 %vm882_vm2, %v4886_v13 }
 0x165   : > { %4038 = vmatprep.mubr.msk.f32.mxu1 %vm882_vm2, %v4890_v14  ;;  %4113 = vmatprep.mubr.msk.f32.mxu0 %vm882_vm2, %v4890_v14 }
 0x168   : > { %4039 = vmatmul.mubr.msk.f32.gmra.mrb[30].mxu1 %vm882_vm2, %v4898_v15  ;;  %4114 = vmatmul.mubr.msk.f32.gmra.mrb[44].mxu0 %vm882_vm2, %v4898_v15 }
 0x169   : > { %4041 = vmatprep.mubr.msk.f32.mxu1 %vm882_vm2, %v4902_v16  ;;  %4116 = vmatprep.mubr.msk.f32.mxu0 %vm882_vm2, %v4902_v16 }
 0x16c   : > { %4042 = vmatmul.mubr.msk.f32.gmra.mrb[32].mxu1 %vm882_vm2, %v4910_v17  ;;  %4117 = vmatmul.mubr.msk.f32.gmra.mrb[46].mxu0 %vm882_vm2, %v4910_v17 }
 0x16d   : > { %4072 = vmatprep.mubr.msk.f32.mxu1 %vm882_vm2, %v4694_v27  ;;  %4119 = vmatprep.mubr.msk.f32.mxu0 %vm882_vm2, %v4925_v19  ;;  %v2790_v27 = vld [vmem:[#allocation2 + $0x138] sm:$0xff] }
 0x170   : > { %4073 = vmatmul.mubr.msk.f32.vlgmr.msra.gmra.mrb[34].mxu1 %vm882_vm2, %v4702_v28  ;;  %4120 = vmatmul.mubr.msk.f32.gmra.mrb[48].mxu0 %vm882_vm2, %v4934_v47 }
 0x171   : > { %4123 = vmatpush3.msk.msra.mxu1 %vm1033_vm7, %v3709_v0  ;;  %4075 = vmatprep.mubr.msk.f32.mxu1 %vm882_vm2, %v4704_v29 }
 0x172   : > { %4174 = vmatprep.subr.msk.mxu1 %vm1033_vm7, %v3745_v18  ;;  %4150 = vmatprep.mubr.msk.f32.mxu0 %vm882_vm2, %v4704_v29 }
 0x174   : > { %4076 = vmatmul.mubr.msk.f32.gmra.mrb[36].mxu1 %vm882_vm2, %v4717_v32  ;;  %4151 = vmatmul.mubr.msk.f32.vlgmr.msra.gmra.mrb[50].mxu0 %vm882_vm2, %v4717_v32 }
 0x175   : > { %4078 = vmatprep.mubr.msk.f32.mxu1 %vm882_vm2, %v4722_v35  ;;  %4201 = vmatpush3.msk.msra.mxu0 %vm1033_vm7, %v3763_v7 }
 0x176   : > { %4153 = vmatprep.mubr.msk.f32.mxu0 %vm882_vm2, %v4722_v35 }
 0x178   : > { %4079 = vmatmul.mubr.msk.f32.gmra.mrb[38].mxu1 %vm882_vm2, %v4737_v39  ;;  %4154 = vmatmul.mubr.msk.f32.gmra.mrb[52].mxu0 %vm882_vm2, %v4737_v39 }
 0x179   : > { %4081 = vmatprep.mubr.msk.f32.mxu1 %vm882_vm2, %v4742_v41  ;;  %4156 = vmatprep.mubr.msk.f32.mxu0 %vm882_vm2, %v4742_v41 }
 0x17c   : > { %4082 = vmatmul.mubr.msk.f32.gmra.mrb[40].mxu1 %vm882_vm2, %v4755_v43  ;;  %4157 = vmatmul.mubr.msk.f32.gmra.mrb[54].mxu0 %vm882_vm2, %v4755_v43 }
 0x17d   : > { %4084 = vmatprep.mubr.msk.f32.mxu1 %vm882_vm2, %v4761_v22  ;;  %4159 = vmatprep.mubr.msk.f32.mxu0 %vm882_vm2, %v4761_v22 }
 0x180   : > { %4085 = vmatmul.mubr.msk.f32.gmra.mrb[42].mxu1 %vm882_vm2, %v4774_v48  ;;  %4160 = vmatmul.mubr.msk.f32.gmra.mrb[56].mxu0 %vm882_vm2, %v4774_v48 }
 0x181   : > { %4087 = vmatprep.mubr.msk.f32.mxu1 %vm882_vm2, %v4780_v50  ;;  %4162 = vmatprep.mubr.msk.f32.mxu0 %vm882_vm2, %v4780_v50 }
 0x184   : > { %4088 = vmatmul.mubr.msk.f32.gmra.mrb[44].mxu1 %vm882_vm2, %v4791_v52  ;;  %4163 = vmatmul.mubr.msk.f32.gmra.mrb[58].mxu0 %vm882_vm2, %v4791_v52 }
 0x185   : > { %4090 = vmatprep.mubr.msk.f32.mxu1 %vm882_vm2, %v4797_v54  ;;  %4165 = vmatprep.mubr.msk.f32.mxu0 %vm882_vm2, %v4797_v54 }
 0x188   : > { %4091 = vmatmul.mubr.msk.f32.gmra.mrb[46].mxu1 %vm882_vm2, %v4807_v56  ;;  %4166 = vmatmul.mubr.msk.f32.gmra.mrb[60].mxu0 %vm882_vm2, %v4807_v56 }
 0x189   : > { %4093 = vmatprep.mubr.msk.f32.mxu1 %vm882_vm2, %v1737_v57  ;;  %4168 = vmatprep.mubr.msk.f32.mxu0 %vm882_vm2, %v1737_v57 }
 0x18c   : > { %4094 = vmatmul.mubr.msk.f32.gmra.mrb[48].mxu1 %vm882_vm2, %v1738_v9  ;;  %4169 = vmatmul.mubr.msk.f32.gmra.mrb[62].mxu0 %vm882_vm2, %v1738_v9 }
 0x18d   : > { %4124 = vmatprep.mubr.msk.f32.mxu1 %vm882_vm2, %v4730_v38  ;;  %4171 = vmatprep.mubr.msk.f32.mxu0 %vm882_vm2, %v2526_v20 }
 0x190   : > { %4125 = vmatmul.mubr.msk.f32.vlgmr.msra.gmra.mrb[50].mxu1 %vm882_vm2, %v4740_v40  ;;  %4172 = vmatmul.mubr.msk.f32.gmra.mrb[64].mxu0 %vm882_vm2, %v2527_v21 }
 0x191   : > { %4175 = vmatpush3.msk.msra.mxu1 %vm1033_vm7, %v3745_v18  ;;  %4127 = vmatprep.mubr.msk.f32.mxu1 %vm882_vm2, %v4747_v42 }
 0x192   : > { %4202 = vmatprep.mubr.msk.f32.mxu0 %vm882_vm2, %v4747_v42 }
 0x194   : > { %4128 = vmatmul.mubr.msk.f32.gmra.mrb[52].mxu1 %vm882_vm2, %v4759_v44  ;;  %4203 = vmatmul.mubr.msk.f32.vlgmr.msra.gmra.mrb[66].mxu0 %vm882_vm2, %v4759_v44 }
 0x195   : > { %4130 = vmatprep.mubr.msk.f32.mxu1 %vm882_vm2, %v4763_v45  ;;  %4205 = vmatprep.mubr.msk.f32.mxu0 %vm882_vm2, %v4763_v45 }
 0x198   : > { %4131 = vmatmul.mubr.msk.f32.gmra.mrb[54].mxu1 %vm882_vm2, %v4778_v49  ;;  %4206 = vmatmul.mubr.msk.f32.gmra.mrb[68].mxu0 %vm882_vm2, %v4778_v49 }
 0x199   : > { %4133 = vmatprep.mubr.msk.f32.mxu1 %vm882_vm2, %v4782_v51  ;;  %4208 = vmatprep.mubr.msk.f32.mxu0 %vm882_vm2, %v4782_v51 }
 0x19c   : > { %4134 = vmatmul.mubr.msk.f32.gmra.mrb[56].mxu1 %vm882_vm2, %v4795_v53  ;;  %4209 = vmatmul.mubr.msk.f32.gmra.mrb[70].mxu0 %vm882_vm2, %v4795_v53 }
 0x19d   : > { %4136 = vmatprep.mubr.msk.f32.mxu1 %vm882_vm2, %v4799_v55  ;;  %4211 = vmatprep.mubr.msk.f32.mxu0 %vm882_vm2, %v4799_v55 }
 0x1a0   : > { %4137 = vmatmul.mubr.msk.f32.gmra.mrb[58].mxu1 %vm882_vm2, %v4811_v58  ;;  %4212 = vmatmul.mubr.msk.f32.gmra.mrb[72].mxu0 %vm882_vm2, %v4811_v58 }
 0x1a1   : > { %4139 = vmatprep.mubr.msk.f32.mxu1 %vm882_vm2, %v4813_v60  ;;  %4214 = vmatprep.mubr.msk.f32.mxu0 %vm882_vm2, %v4813_v60 }
 0x1a4   : > { %4140 = vmatmul.mubr.msk.f32.gmra.mrb[60].mxu1 %vm882_vm2, %v4822_v62  ;;  %4215 = vmatmul.mubr.msk.f32.gmra.mrb[74].mxu0 %vm882_vm2, %v4822_v62 }
 0x1a5   : > { %4142 = vmatprep.mubr.msk.f32.mxu1 %vm882_vm2, %v4827_v1  ;;  %4217 = vmatprep.mubr.msk.f32.mxu0 %vm882_vm2, %v4827_v1 }
 0x1a8   : > { %4143 = vmatmul.mubr.msk.f32.gmra.mrb[62].mxu1 %vm882_vm2, %v4835_v3  ;;  %4218 = vmatmul.mubr.msk.f32.gmra.mrb[76].mxu0 %vm882_vm2, %v4835_v3 }
 0x1a9   : > { %4145 = vmatprep.mubr.msk.f32.mxu1 %vm882_vm2, %v2263_v23  ;;  %4220 = vmatprep.mubr.msk.f32.mxu0 %vm882_vm2, %v2263_v23 }
 0x1ac   : > { %4146 = vmatmul.mubr.msk.f32.gmra.mrb[64].mxu1 %vm882_vm2, %v2264_v30  ;;  %4221 = vmatmul.mubr.msk.f32.gmra.mrb[78].mxu0 %vm882_vm2, %v2264_v30 }
 0x1ad   : > { %4176 = vmatprep.mubr.msk.f32.mxu1 %vm882_vm2, %v4837_v4  ;;  %4223 = vmatprep.mubr.msk.f32.mxu0 %vm882_vm2, %v3052_v24 }
 0x1b0   : > { %4177 = vmatmul.mubr.msk.f32.vlgmr.msra.gmra.mrb[66].mxu1 %vm882_vm2, %v4847_v5  ;;  %4224 = vmatmul.mubr.msk.f32.gmra.mrb[80].mxu0 %vm882_vm2, %v3053_v25 }
 0x1b1   : > { %4179 = vmatprep.mubr.msk.f32.mxu1 %vm882_vm2, %v4850_v6 }
 0x1b4   : > { %4180 = vmatmul.mubr.msk.f32.gmra.mrb[68].mxu1 %vm882_vm2, %v4860_v8 }
 0x1b5   : > { %4182 = vmatprep.mubr.msk.f32.mxu1 %vm882_vm2, %v4863_v10 }
 0x1b8   : > { %4183 = vmatmul.mubr.msk.f32.gmra.mrb[70].mxu1 %vm882_vm2, %v4874_v11 }
 0x1b9   : > { %4185 = vmatprep.mubr.msk.f32.mxu1 %vm882_vm2, %v4878_v12 }
 0x1bc   : > { %4186 = vmatmul.mubr.msk.f32.gmra.mrb[72].mxu1 %vm882_vm2, %v4886_v13 }
 0x1bd   : > { %4188 = vmatprep.mubr.msk.f32.mxu1 %vm882_vm2, %v4890_v14 }
 0x1c0   : > { %4189 = vmatmul.mubr.msk.f32.gmra.mrb[74].mxu1 %vm882_vm2, %v4898_v15 }
 0x1c1   : > { %4191 = vmatprep.mubr.msk.f32.mxu1 %vm882_vm2, %v4902_v16 }
 0x1c4   : > { %4192 = vmatmul.mubr.msk.f32.gmra.mrb[76].mxu1 %vm882_vm2, %v4910_v17 }
 0x1c5   : > { %4194 = vmatprep.mubr.msk.f32.mxu1 %vm882_vm2, %v4925_v19 }
 0x1c8   : > { %4195 = vmatmul.mubr.msk.f32.gmra.mrb[78].mxu1 %vm882_vm2, %v4934_v47 }
 0x1c9   : > { %4197 = vmatprep.mubr.msk.f32.mxu1 %vm882_vm2, %v2789_v26 }
 0x1cc   : > { %4198 = vmatmul.mubr.msk.f32.gmra.mrb[80].mxu1 %vm882_vm2, %v2790_v27 }
 0x203   : > { %v3996_v28 = vpop.f32.mrb[2].mxu1 }
 0x204   : > { %1183 = vst.msk [vmem:[#allocation3 + $0x8] sm:$0xff] %vm475_vm1, %v3996_v28  ;;  %v1103_v29 = vpop.f32.mrb[3].mxu1 }
 0x205   : > { %1182 = vst.msk [vmem:[#allocation3] sm:$0xff] %vm475_vm1, %v1103_v29 }
 0x207   : > { %v3999_v31 = vpop.f32.mrb[4].mxu1  ;;  %v5087_v34 = vpop.f32.mrb[18].mxu0 }
 0x208   : > { %1185 = vst.msk [vmem:[#allocation3 + $0x18] sm:$0xff] %vm475_vm1, %v3999_v31  ;;  %v1113_v32 = vpop.f32.mrb[5].mxu1  ;;  %v5090_v36 = vpop.f32.mrb[19].mxu0 }
 0x209   : > { %1184 = vst.msk [vmem:[#allocation3 + $0x10] sm:$0xff] %vm475_vm1, %v1113_v32 }
 0x20b   : > { %v4002_v33 = vpop.f32.mrb[6].mxu1  ;;  %v5093_v38 = vpop.f32.mrb[20].mxu0  ;;  %v1413_v59 = vld [vmem:[#allocation3 + $0x8] sm:$0xff] }
 0x20c   : > { %1187 = vst.msk [vmem:[#allocation3 + $0x28] sm:$0xff] %vm475_vm1, %v4002_v33  ;;  %v1123_v35 = vpop.f32.mrb[7].mxu1  ;;  %v5096_v40 = vpop.f32.mrb[21].mxu0  ;;  %v1412_v63 = vld [vmem:[#allocation3] sm:$0xff] }
 0x20d   : > { %1186 = vst.msk [vmem:[#allocation3 + $0x20] sm:$0xff] %vm475_vm1, %v1123_v35 }
 0x20f   : > { %v4005_v37 = vpop.f32.mrb[8].mxu1  ;;  %v5099_v42 = vpop.f32.mrb[22].mxu0  ;;  %v1415_v3 = vld [vmem:[#allocation3 + $0x18] sm:$0xff] }
 0x210   : > { %1189 = vst.msk [vmem:[#allocation3 + $0x38] sm:$0xff] %vm475_vm1, %v4005_v37  ;;  %v1133_v39 = vpop.f32.mrb[9].mxu1  ;;  %v5102_v44 = vpop.f32.mrb[23].mxu0  ;;  %v1414_v7 = vld [vmem:[#allocation3 + $0x10] sm:$0xff] }
 0x211   : > { %1188 = vst.msk [vmem:[#allocation3 + $0x30] sm:$0xff] %vm475_vm1, %v1133_v39 }
 0x213   : > { %v4008_v41 = vpop.f32.mrb[10].mxu1  ;;  %v5105_v45 = vpop.f32.mrb[24].mxu0  ;;  %v1417_v12 = vld [vmem:[#allocation3 + $0x28] sm:$0xff] }
 0x214   : > { %1191 = vst.msk [vmem:[#allocation3 + $0x48] sm:$0xff] %vm475_vm1, %v4008_v41  ;;  %v1143_v43 = vpop.f32.mrb[11].mxu1  ;;  %v5108_v48 = vpop.f32.mrb[25].mxu0  ;;  %v1416_v16 = vld [vmem:[#allocation3 + $0x20] sm:$0xff] }
 0x215   : > { %1190 = vst.msk [vmem:[#allocation3 + $0x40] sm:$0xff] %vm475_vm1, %v1143_v43 }
 0x217   : > { %v4011_v22 = vpop.f32.mrb[12].mxu1  ;;  %v5111_v50 = vpop.f32.mrb[26].mxu0  ;;  %v1419_v21 = vld [vmem:[#allocation3 + $0x38] sm:$0xff] }
 0x218   : > { %1193 = vst.msk [vmem:[#allocation3 + $0x58] sm:$0xff] %vm475_vm1, %v4011_v22  ;;  %v1153_v46 = vpop.f32.mrb[13].mxu1  ;;  %v5114_v52 = vpop.f32.mrb[27].mxu0  ;;  %v1418_v25 = vld [vmem:[#allocation3 + $0x30] sm:$0xff] }
 0x219   : > { %1192 = vst.msk [vmem:[#allocation3 + $0x50] sm:$0xff] %vm475_vm1, %v1153_v46 }
 0x21b   : > { %v4014_v49 = vpop.f32.mrb[14].mxu1  ;;  %v5117_v54 = vpop.f32.mrb[28].mxu0 }
 0x21c   : > { %1195 = vst.msk [vmem:[#allocation3 + $0x68] sm:$0xff] %vm475_vm1, %v4014_v49  ;;  %v1163_v51 = vpop.f32.mrb[15].mxu1  ;;  %v5120_v56 = vpop.f32.mrb[29].mxu0  ;;  %v1420_v39 = vld [vmem:[#allocation3 + $0x40] sm:$0xff] }
 0x21d   : > { %1194 = vst.msk [vmem:[#allocation3 + $0x60] sm:$0xff] %vm475_vm1, %v1163_v51 }
 0x21f   : > { %v4017_v53 = vpop.f32.mrb[16].mxu1  ;;  %v5123_v60 = vpop.f32.mrb[30].mxu0  ;;  %v1423_v51 = vld [vmem:[#allocation3 + $0x58] sm:$0xff] }
 0x220   : > { %1197 = vst.msk [vmem:[#allocation3 + $0x78] sm:$0xff] %vm475_vm1, %v4017_v53  ;;  %v1173_v55 = vpop.f32.mrb[17].mxu1  ;;  %v5125_v0 = vpop.f32.mrb[31].mxu0 }
 0x221   : > { %1196 = vst.msk [vmem:[#allocation3 + $0x70] sm:$0xff] %vm475_vm1, %v1173_v55 }
 0x223   : > { %v4022_v58 = vpop.f32.mrb[18].mxu1  ;;  %v5129_v4 = vpop.f32.mrb[32].mxu0 }
 0x224   : > { %v1429_v61 = vadd.f32 %v4022_v58, %v1413_v59  ;;  %v1333_v62 = vpop.f32.mrb[19].mxu1  ;;  %v5131_v8 = vpop.f32.mrb[33].mxu0  ;;  %v1422_v59 = vld [vmem:[#allocation3 + $0x50] sm:$0xff] }
 0x225   : > { %v1428_v1 = vadd.f32 %v1412_v63, %v1333_v62 }
 0x226   : > { %1445 = vst.msk [vmem:[#allocation3 + $0x8] sm:$0xff] %vm475_vm1, %v1429_v61 }
 0x227   : > { %1444 = vst.msk [vmem:[#allocation3] sm:$0xff] %vm475_vm1, %v1428_v1  ;;  %v4025_v2 = vpop.f32.mrb[20].mxu1  ;;  %v5135_v13 = vpop.f32.mrb[34].mxu0 }
 0x228   : > { %v1431_v5 = vadd.f32 %v4025_v2, %v1415_v3  ;;  %v1343_v6 = vpop.f32.mrb[21].mxu1  ;;  %v5137_v17 = vpop.f32.mrb[35].mxu0  ;;  %v1425_v3 = vld [vmem:[#allocation3 + $0x68] sm:$0xff] }
 0x229   : > { %v1430_v10 = vadd.f32 %v1414_v7, %v1343_v6 }
 0x22a   : > { %1447 = vst.msk [vmem:[#allocation3 + $0x18] sm:$0xff] %vm475_vm1, %v1431_v5 }
 0x22b   : > { %1446 = vst.msk [vmem:[#allocation3 + $0x10] sm:$0xff] %vm475_vm1, %v1430_v10  ;;  %v4028_v11 = vpop.f32.mrb[22].mxu1  ;;  %v5143_v23 = vpop.f32.mrb[36].mxu0  ;;  %v1424_v10 = vld [vmem:[#allocation3 + $0x60] sm:$0xff] }
 0x22c   : > { %v1433_v14 = vadd.f32 %v4028_v11, %v1417_v12  ;;  %v1353_v15 = vpop.f32.mrb[23].mxu1  ;;  %v5146_v26 = vpop.f32.mrb[37].mxu0 }
 0x22d   : > { %v1432_v18 = vadd.f32 %v1416_v16, %v1353_v15  ;;  %v1675_v19 = vld [vmem:[#allocation3 + $0x8] sm:$0xff] }
 0x22e   : > { %1449 = vst.msk [vmem:[#allocation3 + $0x28] sm:$0xff] %vm475_vm1, %v1433_v14  ;;  %v1691_v47 = vadd.f32 %v5087_v34, %v1675_v19  ;;  %v1674_v57 = vld [vmem:[#allocation3] sm:$0xff]  ;;  %v1421_v34 = vld [vmem:[#allocation3 + $0x48] sm:$0xff] }
 0x22f   : > { %1448 = vst.msk [vmem:[#allocation3 + $0x20] sm:$0xff] %vm475_vm1, %v1432_v18  ;;  %v1690_v9 = vadd.f32 %v1674_v57, %v5090_v36  ;;  %v4031_v20 = vpop.f32.mrb[24].mxu1  ;;  %v5153_v35 = vpop.f32.mrb[38].mxu0  ;;  %v1427_v18 = vld [vmem:[#allocation3 + $0x78] sm:$0xff] }
 0x230   : > { %1707 = vst.msk [vmem:[#allocation3 + $0x8] sm:$0xff] %vm475_vm1, %v1691_v47  ;;  %v1435_v30 = vadd.f32 %v4031_v20, %v1419_v21  ;;  %v1363_v24 = vpop.f32.mrb[25].mxu1  ;;  %v5156_v41 = vpop.f32.mrb[39].mxu0 }
 0x231   : > { %1706 = vst.msk [vmem:[#allocation3] sm:$0xff] %vm475_vm1, %v1690_v9  ;;  %v1434_v27 = vadd.f32 %v1418_v25, %v1363_v24  ;;  %v1677_v28 = vld [vmem:[#allocation3 + $0x18] sm:$0xff]  ;;  %v1426_v9 = vld [vmem:[#allocation3 + $0x70] sm:$0xff] }
 0x232   : > { %1451 = vst.msk [vmem:[#allocation3 + $0x38] sm:$0xff] %vm475_vm1, %v1435_v30  ;;  %v1693_v29 = vadd.f32 %v5093_v38, %v1677_v28  ;;  %v1676_v31 = vld [vmem:[#allocation3 + $0x10] sm:$0xff] }
 0x233   : > { %1450 = vst.msk [vmem:[#allocation3 + $0x30] sm:$0xff] %vm475_vm1, %v1434_v27  ;;  %v1692_v32 = vadd.f32 %v1676_v31, %v5096_v40  ;;  %v4034_v33 = vpop.f32.mrb[26].mxu1  ;;  %v5163_v53 = vpop.f32.mrb[40].mxu0 }
 0x234   : > { %1709 = vst.msk [vmem:[#allocation3 + $0x18] sm:$0xff] %vm475_vm1, %v1693_v29  ;;  %v1437_v36 = vadd.f32 %v4034_v33, %v1421_v34  ;;  %v1373_v37 = vpop.f32.mrb[27].mxu1  ;;  %v5166_v61 = vpop.f32.mrb[41].mxu0 }
 0x235   : > { %1708 = vst.msk [vmem:[#allocation3 + $0x10] sm:$0xff] %vm475_vm1, %v1692_v32  ;;  %v1436_v43 = vadd.f32 %v1420_v39, %v1373_v37  ;;  %v1679_v38 = vld [vmem:[#allocation3 + $0x28] sm:$0xff] }
 0x236   : > { %1453 = vst.msk [vmem:[#allocation3 + $0x48] sm:$0xff] %vm475_vm1, %v1437_v36  ;;  %v1695_v22 = vadd.f32 %v5099_v42, %v1679_v38  ;;  %v1678_v40 = vld [vmem:[#allocation3 + $0x20] sm:$0xff] }
 0x237   : > { %1452 = vst.msk [vmem:[#allocation3 + $0x40] sm:$0xff] %vm475_vm1, %v1436_v43  ;;  %v1694_v46 = vadd.f32 %v1678_v40, %v5102_v44  ;;  %v4037_v49 = vpop.f32.mrb[28].mxu1  ;;  %v5173_v5 = vpop.f32.mrb[42].mxu0  ;;  %v1938_v27 = vld [vmem:[#allocation3 + $0x8] sm:$0xff] }
 0x238   : > { %1711 = vst.msk [vmem:[#allocation3 + $0x28] sm:$0xff] %vm475_vm1, %v1695_v22  ;;  %v1439_v55 = vadd.f32 %v4037_v49, %v1423_v51  ;;  %v1383_v58 = vpop.f32.mrb[29].mxu1  ;;  %v5176_v11 = vpop.f32.mrb[43].mxu0  ;;  %v1937_v32 = vld [vmem:[#allocation3] sm:$0xff] }
 0x239   : > { %1710 = vst.msk [vmem:[#allocation3 + $0x20] sm:$0xff] %vm475_vm1, %v1694_v46  ;;  %v1438_v62 = vadd.f32 %v1422_v59, %v1383_v58  ;;  %v1681_v42 = vld [vmem:[#allocation3 + $0x38] sm:$0xff] }
 0x23a   : > { %1455 = vst.msk [vmem:[#allocation3 + $0x58] sm:$0xff] %vm475_vm1, %v1439_v55  ;;  %v1697_v63 = vadd.f32 %v5105_v45, %v1681_v42  ;;  %v1680_v44 = vld [vmem:[#allocation3 + $0x30] sm:$0xff] }
 0x23b   : > { %1454 = vst.msk [vmem:[#allocation3 + $0x50] sm:$0xff] %vm475_vm1, %v1438_v62  ;;  %v1696_v1 = vadd.f32 %v1680_v44, %v5108_v48  ;;  %v4040_v2 = vpop.f32.mrb[30].mxu1  ;;  %v5183_v19 = vpop.f32.mrb[44].mxu0  ;;  %v1940_v43 = vld [vmem:[#allocation3 + $0x18] sm:$0xff] }
 0x23c   : > { %1713 = vst.msk [vmem:[#allocation3 + $0x38] sm:$0xff] %vm475_vm1, %v1697_v63  ;;  %v1441_v6 = vadd.f32 %v4040_v2, %v1425_v3  ;;  %v1393_v7 = vpop.f32.mrb[31].mxu1  ;;  %v5186_v20 = vpop.f32.mrb[45].mxu0  ;;  %v1939_v46 = vld [vmem:[#allocation3 + $0x10] sm:$0xff] }
 0x23d   : > { %1712 = vst.msk [vmem:[#allocation3 + $0x30] sm:$0xff] %vm475_vm1, %v1696_v1  ;;  %v1440_v12 = vadd.f32 %v1424_v10, %v1393_v7  ;;  %v1683_v45 = vld [vmem:[#allocation3 + $0x48] sm:$0xff] }
 0x23e   : > { %1457 = vst.msk [vmem:[#allocation3 + $0x68] sm:$0xff] %vm475_vm1, %v1441_v6  ;;  %v1699_v14 = vadd.f32 %v5111_v50, %v1683_v45  ;;  %v1682_v48 = vld [vmem:[#allocation3 + $0x40] sm:$0xff] }
 0x23f   : > { %1456 = vst.msk [vmem:[#allocation3 + $0x60] sm:$0xff] %vm475_vm1, %v1440_v12  ;;  %v1698_v15 = vadd.f32 %v1682_v48, %v5114_v52  ;;  %v4043_v16 = vpop.f32.mrb[32].mxu1  ;;  %v5193_v28 = vpop.f32.mrb[46].mxu0  ;;  %v1942_v62 = vld [vmem:[#allocation3 + $0x28] sm:$0xff] }
 0x240   : > { %1715 = vst.msk [vmem:[#allocation3 + $0x48] sm:$0xff] %vm475_vm1, %v1699_v14  ;;  %v1443_v47 = vadd.f32 %v4043_v16, %v1427_v18  ;;  %v1403_v57 = vpop.f32.mrb[33].mxu1  ;;  %v5196_v33 = vpop.f32.mrb[47].mxu0  ;;  %v1941_v1 = vld [vmem:[#allocation3 + $0x20] sm:$0xff] }
 0x241   : > { %1714 = vst.msk [vmem:[#allocation3 + $0x40] sm:$0xff] %vm475_vm1, %v1698_v15  ;;  %v1442_v21 = vadd.f32 %v1426_v9, %v1403_v57  ;;  %v1685_v50 = vld [vmem:[#allocation3 + $0x58] sm:$0xff] }
 0x242   : > { %1459 = vst.msk [vmem:[#allocation3 + $0x78] sm:$0xff] %vm475_vm1, %v1443_v47  ;;  %v1701_v30 = vadd.f32 %v5117_v54, %v1685_v50  ;;  %v1684_v52 = vld [vmem:[#allocation3 + $0x50] sm:$0xff] }
 0x243   : > { %1458 = vst.msk [vmem:[#allocation3 + $0x70] sm:$0xff] %vm475_vm1, %v1442_v21  ;;  %v1700_v24 = vadd.f32 %v1684_v52, %v5120_v56  ;;  %v4074_v25 = vpop.f32.mrb[34].mxu1  ;;  %v5203_v38 = vpop.f32.mrb[48].mxu0  ;;  %v1944_v12 = vld [vmem:[#allocation3 + $0x38] sm:$0xff] }
 0x244   : > { %1717 = vst.msk [vmem:[#allocation3 + $0x58] sm:$0xff] %vm475_vm1, %v1701_v30  ;;  %v1954_v29 = vadd.f32 %v4074_v25, %v1938_v27  ;;  %v1858_v31 = vpop.f32.mrb[35].mxu1  ;;  %v5206_v49 = vpop.f32.mrb[49].mxu0  ;;  %v1943_v15 = vld [vmem:[#allocation3 + $0x30] sm:$0xff] }
 0x245   : > { %1716 = vst.msk [vmem:[#allocation3 + $0x50] sm:$0xff] %vm475_vm1, %v1700_v24  ;;  %v1953_v34 = vadd.f32 %v1937_v32, %v1858_v31  ;;  %v1687_v54 = vld [vmem:[#allocation3 + $0x68] sm:$0xff] }
 0x246   : > { %1970 = vst.msk [vmem:[#allocation3 + $0x8] sm:$0xff] %vm475_vm1, %v1954_v29  ;;  %v1703_v36 = vadd.f32 %v5123_v60, %v1687_v54  ;;  %v1686_v56 = vld [vmem:[#allocation3 + $0x60] sm:$0xff] }
 0x247   : > { %1969 = vst.msk [vmem:[#allocation3] sm:$0xff] %vm475_vm1, %v1953_v34  ;;  %v1702_v37 = vadd.f32 %v1686_v56, %v5125_v0  ;;  %v4077_v39 = vpop.f32.mrb[36].mxu1  ;;  %v5213_v42 = vpop.f32.mrb[50].mxu0  ;;  %v1946_v21 = vld [vmem:[#allocation3 + $0x48] sm:$0xff] }
 0x248   : > { %1719 = vst.msk [vmem:[#allocation3 + $0x68] sm:$0xff] %vm475_vm1, %v1703_v36  ;;  %v1956_v22 = vadd.f32 %v4077_v39, %v1940_v43  ;;  %v1868_v40 = vpop.f32.mrb[37].mxu1  ;;  %v5216_v2 = vpop.f32.mrb[51].mxu0  ;;  %v1945_v24 = vld [vmem:[#allocation3 + $0x40] sm:$0xff] }
 0x249   : > { %1718 = vst.msk [vmem:[#allocation3 + $0x60] sm:$0xff] %vm475_vm1, %v1702_v37  ;;  %v1955_v51 = vadd.f32 %v1939_v46, %v1868_v40  ;;  %v1689_v60 = vld [vmem:[#allocation3 + $0x78] sm:$0xff] }
 0x24a   : > { %1972 = vst.msk [vmem:[#allocation3 + $0x18] sm:$0xff] %vm475_vm1, %v1956_v22  ;;  %v1705_v55 = vadd.f32 %v5129_v4, %v1689_v60  ;;  %v1688_v0 = vld [vmem:[#allocation3 + $0x70] sm:$0xff] }
 0x24b   : > { %1971 = vst.msk [vmem:[#allocation3 + $0x10] sm:$0xff] %vm475_vm1, %v1955_v51  ;;  %v1704_v58 = vadd.f32 %v1688_v0, %v5131_v8  ;;  %v4080_v59 = vpop.f32.mrb[38].mxu1  ;;  %v5223_v45 = vpop.f32.mrb[52].mxu0  ;;  %v1948_v34 = vld [vmem:[#allocation3 + $0x58] sm:$0xff] }
 0x24c   : > { %1721 = vst.msk [vmem:[#allocation3 + $0x78] sm:$0xff] %vm475_vm1, %v1705_v55  ;;  %v1958_v63 = vadd.f32 %v4080_v59, %v1942_v62  ;;  %v1878_v44 = vpop.f32.mrb[39].mxu1  ;;  %v5226_v16 = vpop.f32.mrb[53].mxu0  ;;  %v1947_v37 = vld [vmem:[#allocation3 + $0x50] sm:$0xff] }
 0x24d   : > { %1720 = vst.msk [vmem:[#allocation3 + $0x70] sm:$0xff] %vm475_vm1, %v1704_v58  ;;  %v1957_v3 = vadd.f32 %v1941_v1, %v1878_v44  ;;  %v2201_v4 = vld [vmem:[#allocation3 + $0x8] sm:$0xff] }
 0x24e   : > { %1974 = vst.msk [vmem:[#allocation3 + $0x28] sm:$0xff] %vm475_vm1, %v1958_v63  ;;  %v2217_v6 = vadd.f32 %v5135_v13, %v2201_v4  ;;  %v2200_v8 = vld [vmem:[#allocation3] sm:$0xff] }
 0x24f   : > { %1973 = vst.msk [vmem:[#allocation3 + $0x20] sm:$0xff] %vm475_vm1, %v1957_v3  ;;  %v2216_v7 = vadd.f32 %v2200_v8, %v5137_v17  ;;  %v4083_v10 = vpop.f32.mrb[40].mxu1  ;;  %v5233_v50 = vpop.f32.mrb[54].mxu0  ;;  %v1950_v51 = vld [vmem:[#allocation3 + $0x68] sm:$0xff] }
 0x250   : > { %2233 = vst.msk [vmem:[#allocation3 + $0x8] sm:$0xff] %vm475_vm1, %v2217_v6  ;;  %v1960_v14 = vadd.f32 %v4083_v10, %v1944_v12  ;;  %v1888_v48 = vpop.f32.mrb[41].mxu1  ;;  %v5236_v25 = vpop.f32.mrb[55].mxu0  ;;  %v1949_v58 = vld [vmem:[#allocation3 + $0x60] sm:$0xff] }
 0x251   : > { %2232 = vst.msk [vmem:[#allocation3] sm:$0xff] %vm475_vm1, %v2216_v7  ;;  %v1959_v18 = vadd.f32 %v1943_v15, %v1888_v48  ;;  %v2203_v13 = vld [vmem:[#allocation3 + $0x18] sm:$0xff] }
 0x252   : > { %1976 = vst.msk [vmem:[#allocation3 + $0x38] sm:$0xff] %vm475_vm1, %v1960_v14  ;;  %v2219_v47 = vadd.f32 %v5143_v23, %v2203_v13  ;;  %v2202_v17 = vld [vmem:[#allocation3 + $0x10] sm:$0xff] }
 0x253   : > { %1975 = vst.msk [vmem:[#allocation3 + $0x30] sm:$0xff] %vm475_vm1, %v1959_v18  ;;  %v2218_v57 = vadd.f32 %v2202_v17, %v5146_v26  ;;  %v4086_v9 = vpop.f32.mrb[42].mxu1  ;;  %v5243_v54 = vpop.f32.mrb[56].mxu0  ;;  %v1952_v3 = vld [vmem:[#allocation3 + $0x78] sm:$0xff] }
 0x254   : > { %2235 = vst.msk [vmem:[#allocation3 + $0x18] sm:$0xff] %vm475_vm1, %v2219_v47  ;;  %v1962_v30 = vadd.f32 %v4086_v9, %v1946_v21  ;;  %v1898_v52 = vpop.f32.mrb[43].mxu1  ;;  %v5246_v39 = vpop.f32.mrb[57].mxu0  ;;  %v1951_v7 = vld [vmem:[#allocation3 + $0x70] sm:$0xff] }
 0x255   : > { %2234 = vst.msk [vmem:[#allocation3 + $0x10] sm:$0xff] %vm475_vm1, %v2218_v57  ;;  %v1961_v27 = vadd.f32 %v1945_v24, %v1898_v52  ;;  %v2205_v23 = vld [vmem:[#allocation3 + $0x28] sm:$0xff] }
 0x256   : > { %1978 = vst.msk [vmem:[#allocation3 + $0x48] sm:$0xff] %vm475_vm1, %v1962_v30  ;;  %v2221_v29 = vadd.f32 %v5153_v35, %v2205_v23  ;;  %v2204_v26 = vld [vmem:[#allocation3 + $0x20] sm:$0xff] }
 0x257   : > { %1977 = vst.msk [vmem:[#allocation3 + $0x40] sm:$0xff] %vm475_vm1, %v1961_v27  ;;  %v2220_v31 = vadd.f32 %v2204_v26, %v5156_v41  ;;  %v4089_v32 = vpop.f32.mrb[44].mxu1  ;;  %v5253_v60 = vpop.f32.mrb[58].mxu0  ;;  %v2464_v18 = vld [vmem:[#allocation3 + $0x8] sm:$0xff] }
 0x258   : > { %2237 = vst.msk [vmem:[#allocation3 + $0x28] sm:$0xff] %vm475_vm1, %v2221_v29  ;;  %v1964_v36 = vadd.f32 %v4089_v32, %v1948_v34  ;;  %v1908_v56 = vpop.f32.mrb[45].mxu1  ;;  %v5256_v59 = vpop.f32.mrb[59].mxu0  ;;  %v2463_v57 = vld [vmem:[#allocation3] sm:$0xff] }
 0x259   : > { %2236 = vst.msk [vmem:[#allocation3 + $0x20] sm:$0xff] %vm475_vm1, %v2220_v31  ;;  %v1963_v43 = vadd.f32 %v1947_v37, %v1908_v56  ;;  %v2207_v35 = vld [vmem:[#allocation3 + $0x38] sm:$0xff] }
 0x25a   : > { %1980 = vst.msk [vmem:[#allocation3 + $0x58] sm:$0xff] %vm475_vm1, %v1964_v36  ;;  %v2223_v22 = vadd.f32 %v5163_v53, %v2207_v35  ;;  %v2206_v41 = vld [vmem:[#allocation3 + $0x30] sm:$0xff] }
 0x25b   : > { %1979 = vst.msk [vmem:[#allocation3 + $0x50] sm:$0xff] %vm475_vm1, %v1963_v43  ;;  %v2222_v40 = vadd.f32 %v2206_v41, %v5166_v61  ;;  %v4092_v46 = vpop.f32.mrb[46].mxu1  ;;  %v5263_v4 = vpop.f32.mrb[60].mxu0  ;;  %v2466_v27 = vld [vmem:[#allocation3 + $0x18] sm:$0xff] }
 0x25c   : > { %2239 = vst.msk [vmem:[#allocation3 + $0x38] sm:$0xff] %vm475_vm1, %v2223_v22  ;;  %v1966_v55 = vadd.f32 %v4092_v46, %v1950_v51  ;;  %v1918_v0 = vpop.f32.mrb[47].mxu1  ;;  %v5266_v10 = vpop.f32.mrb[61].mxu0  ;;  %v2465_v31 = vld [vmem:[#allocation3 + $0x10] sm:$0xff] }
 0x25d   : > { %2238 = vst.msk [vmem:[#allocation3 + $0x30] sm:$0xff] %vm475_vm1, %v2222_v40  ;;  %v1965_v62 = vadd.f32 %v1949_v58, %v1918_v0  ;;  %v2209_v53 = vld [vmem:[#allocation3 + $0x48] sm:$0xff] }
 0x25e   : > { %1982 = vst.msk [vmem:[#allocation3 + $0x68] sm:$0xff] %vm475_vm1, %v1966_v55  ;;  %v2225_v63 = vadd.f32 %v5173_v5, %v2209_v53  ;;  %v2208_v61 = vld [vmem:[#allocation3 + $0x40] sm:$0xff] }
 0x25f   : > { %1981 = vst.msk [vmem:[#allocation3 + $0x60] sm:$0xff] %vm475_vm1, %v1965_v62  ;;  %v2224_v44 = vadd.f32 %v2208_v61, %v5176_v11  ;;  %v4095_v1 = vpop.f32.mrb[48].mxu1  ;;  %v5273_v13 = vpop.f32.mrb[62].mxu0  ;;  %v2468_v43 = vld [vmem:[#allocation3 + $0x28] sm:$0xff] }
 0x260   : > { %2241 = vst.msk [vmem:[#allocation3 + $0x48] sm:$0xff] %vm475_vm1, %v2225_v63  ;;  %v1968_v6 = vadd.f32 %v4095_v1, %v1952_v3  ;;  %v1928_v8 = vpop.f32.mrb[49].mxu1  ;;  %v5276_v9 = vpop.f32.mrb[63].mxu0  ;;  %v2467_v40 = vld [vmem:[#allocation3 + $0x20] sm:$0xff] }
 0x261   : > { %2240 = vst.msk [vmem:[#allocation3 + $0x40] sm:$0xff] %vm475_vm1, %v2224_v44  ;;  %v1967_v12 = vadd.f32 %v1951_v7, %v1928_v8  ;;  %v2211_v5 = vld [vmem:[#allocation3 + $0x58] sm:$0xff] }
 0x262   : > { %1984 = vst.msk [vmem:[#allocation3 + $0x78] sm:$0xff] %vm475_vm1, %v1968_v6  ;;  %v2227_v14 = vadd.f32 %v5183_v19, %v2211_v5  ;;  %v2210_v11 = vld [vmem:[#allocation3 + $0x50] sm:$0xff] }
 0x263   : > { %1983 = vst.msk [vmem:[#allocation3 + $0x70] sm:$0xff] %vm475_vm1, %v1967_v12  ;;  %v2226_v48 = vadd.f32 %v2210_v11, %v5186_v20  ;;  %v4126_v15 = vpop.f32.mrb[50].mxu1  ;;  %v5283_v23 = vpop.f32.mrb[64].mxu0  ;;  %v2470_v62 = vld [vmem:[#allocation3 + $0x38] sm:$0xff] }
 0x264   : > { %2243 = vst.msk [vmem:[#allocation3 + $0x58] sm:$0xff] %vm475_vm1, %v2227_v14  ;;  %v2480_v47 = vadd.f32 %v4126_v15, %v2464_v18  ;;  %v2384_v17 = vpop.f32.mrb[51].mxu1  ;;  %v5286_v32 = vpop.f32.mrb[65].mxu0  ;;  %v2469_v44 = vld [vmem:[#allocation3 + $0x30] sm:$0xff] }
 0x265   : > { %2242 = vst.msk [vmem:[#allocation3 + $0x50] sm:$0xff] %vm475_vm1, %v2226_v48  ;;  %v2479_v21 = vadd.f32 %v2463_v57, %v2384_v17  ;;  %v2213_v19 = vld [vmem:[#allocation3 + $0x68] sm:$0xff] }
 0x266   : > { %2496 = vst.msk [vmem:[#allocation3 + $0x8] sm:$0xff] %vm475_vm1, %v2480_v47  ;;  %v2229_v30 = vadd.f32 %v5193_v28, %v2213_v19  ;;  %v2212_v20 = vld [vmem:[#allocation3 + $0x60] sm:$0xff] }
 0x267   : > { %2495 = vst.msk [vmem:[#allocation3] sm:$0xff] %vm475_vm1, %v2479_v21  ;;  %v2228_v52 = vadd.f32 %v2212_v20, %v5196_v33  ;;  %v4129_v24 = vpop.f32.mrb[52].mxu1  ;;  %v5293_v35 = vpop.f32.mrb[66].mxu0  ;;  %v2472_v12 = vld [vmem:[#allocation3 + $0x48] sm:$0xff] }
 0x268   : > { %2245 = vst.msk [vmem:[#allocation3 + $0x68] sm:$0xff] %vm475_vm1, %v2229_v30  ;;  %v2482_v29 = vadd.f32 %v4129_v24, %v2466_v27  ;;  %v2394_v26 = vpop.f32.mrb[53].mxu1  ;;  %v5296_v46 = vpop.f32.mrb[67].mxu0  ;;  %v2471_v48 = vld [vmem:[#allocation3 + $0x40] sm:$0xff] }
 0x269   : > { %2244 = vst.msk [vmem:[#allocation3 + $0x60] sm:$0xff] %vm475_vm1, %v2228_v52  ;;  %v2481_v34 = vadd.f32 %v2465_v31, %v2394_v26  ;;  %v2215_v28 = vld [vmem:[#allocation3 + $0x78] sm:$0xff] }
 0x26a   : > { %2498 = vst.msk [vmem:[#allocation3 + $0x18] sm:$0xff] %vm475_vm1, %v2482_v29  ;;  %v2231_v36 = vadd.f32 %v5203_v38, %v2215_v28  ;;  %v2214_v33 = vld [vmem:[#allocation3 + $0x70] sm:$0xff] }
 0x26b   : > { %2497 = vst.msk [vmem:[#allocation3 + $0x10] sm:$0xff] %vm475_vm1, %v2481_v34  ;;  %v2230_v56 = vadd.f32 %v2214_v33, %v5206_v49  ;;  %v4132_v37 = vpop.f32.mrb[54].mxu1  ;;  %v5303_v53 = vpop.f32.mrb[68].mxu0  ;;  %v2474_v21 = vld [vmem:[#allocation3 + $0x58] sm:$0xff] }
 0x26c   : > { %2247 = vst.msk [vmem:[#allocation3 + $0x78] sm:$0xff] %vm475_vm1, %v2231_v36  ;;  %v2484_v22 = vadd.f32 %v4132_v37, %v2468_v43  ;;  %v2404_v41 = vpop.f32.mrb[55].mxu1  ;;  %v5306_v1 = vpop.f32.mrb[69].mxu0  ;;  %v2473_v52 = vld [vmem:[#allocation3 + $0x50] sm:$0xff] }
 0x26d   : > { %2246 = vst.msk [vmem:[#allocation3 + $0x70] sm:$0xff] %vm475_vm1, %v2230_v56  ;;  %v2483_v51 = vadd.f32 %v2467_v40, %v2404_v41  ;;  %v2727_v38 = vld [vmem:[#allocation3 + $0x8] sm:$0xff] }
 0x26e   : > { %2500 = vst.msk [vmem:[#allocation3 + $0x28] sm:$0xff] %vm475_vm1, %v2484_v22  ;;  %v2743_v55 = vadd.f32 %v5213_v42, %v2727_v38  ;;  %v2726_v49 = vld [vmem:[#allocation3] sm:$0xff] }
 0x26f   : > { %2499 = vst.msk [vmem:[#allocation3 + $0x20] sm:$0xff] %vm475_vm1, %v2483_v51  ;;  %v2742_v0 = vadd.f32 %v2726_v49, %v5216_v2  ;;  %v4135_v58 = vpop.f32.mrb[56].mxu1  ;;  %v5313_v5 = vpop.f32.mrb[70].mxu0  ;;  %v2476_v34 = vld [vmem:[#allocation3 + $0x68] sm:$0xff] }
 0x270   : > { %2759 = vst.msk [vmem:[#allocation3 + $0x8] sm:$0xff] %vm475_vm1, %v2743_v55  ;;  %v2486_v63 = vadd.f32 %v4135_v58, %v2470_v62  ;;  %v2414_v61 = vpop.f32.mrb[57].mxu1  ;;  %v5316_v15 = vpop.f32.mrb[71].mxu0  ;;  %v2475_v56 = vld [vmem:[#allocation3 + $0x60] sm:$0xff] }
 0x271   : > { %2758 = vst.msk [vmem:[#allocation3] sm:$0xff] %vm475_vm1, %v2742_v0  ;;  %v2485_v3 = vadd.f32 %v2469_v44, %v2414_v61  ;;  %v2729_v42 = vld [vmem:[#allocation3 + $0x18] sm:$0xff] }
 0x272   : > { %2502 = vst.msk [vmem:[#allocation3 + $0x38] sm:$0xff] %vm475_vm1, %v2486_v63  ;;  %v2745_v6 = vadd.f32 %v5223_v45, %v2729_v42  ;;  %v2728_v2 = vld [vmem:[#allocation3 + $0x10] sm:$0xff] }
 0x273   : > { %2501 = vst.msk [vmem:[#allocation3 + $0x30] sm:$0xff] %vm475_vm1, %v2485_v3  ;;  %v2744_v8 = vadd.f32 %v2728_v2, %v5226_v16  ;;  %v4138_v7 = vpop.f32.mrb[58].mxu1  ;;  %v5323_v19 = vpop.f32.mrb[72].mxu0  ;;  %v2478_v51 = vld [vmem:[#allocation3 + $0x78] sm:$0xff] }
 0x274   : > { %2761 = vst.msk [vmem:[#allocation3 + $0x18] sm:$0xff] %vm475_vm1, %v2745_v6  ;;  %v2488_v14 = vadd.f32 %v4138_v7, %v2472_v12  ;;  %v2424_v11 = vpop.f32.mrb[59].mxu1  ;;  %v5326_v24 = vpop.f32.mrb[73].mxu0  ;;  %v2477_v0 = vld [vmem:[#allocation3 + $0x70] sm:$0xff] }
 0x275   : > { %2760 = vst.msk [vmem:[#allocation3 + $0x10] sm:$0xff] %vm475_vm1, %v2744_v8  ;;  %v2487_v18 = vadd.f32 %v2471_v48, %v2424_v11  ;;  %v2731_v45 = vld [vmem:[#allocation3 + $0x28] sm:$0xff] }
 0x276   : > { %2504 = vst.msk [vmem:[#allocation3 + $0x48] sm:$0xff] %vm475_vm1, %v2488_v14  ;;  %v2747_v47 = vadd.f32 %v5233_v50, %v2731_v45  ;;  %v2730_v16 = vld [vmem:[#allocation3 + $0x20] sm:$0xff] }
 0x277   : > { %2503 = vst.msk [vmem:[#allocation3 + $0x40] sm:$0xff] %vm475_vm1, %v2487_v18  ;;  %v2746_v17 = vadd.f32 %v2730_v16, %v5236_v25  ;;  %v4141_v57 = vpop.f32.mrb[60].mxu1  ;;  %v5333_v28 = vpop.f32.mrb[74].mxu0  ;;  %v2990_v3 = vld [vmem:[#allocation3 + $0x8] sm:$0xff] }
 0x278   : > { %2763 = vst.msk [vmem:[#allocation3 + $0x28] sm:$0xff] %vm475_vm1, %v2747_v47  ;;  %v2490_v30 = vadd.f32 %v4141_v57, %v2474_v21  ;;  %v2434_v20 = vpop.f32.mrb[61].mxu1  ;;  %v5336_v37 = vpop.f32.mrb[75].mxu0  ;;  %v2989_v8 = vld [vmem:[#allocation3] sm:$0xff] }
 0x279   : > { %2762 = vst.msk [vmem:[#allocation3 + $0x20] sm:$0xff] %vm475_vm1, %v2746_v17  ;;  %v2489_v27 = vadd.f32 %v2473_v52, %v2434_v20  ;;  %v2733_v50 = vld [vmem:[#allocation3 + $0x38] sm:$0xff] }
 0x27a   : > { %2506 = vst.msk [vmem:[#allocation3 + $0x58] sm:$0xff] %vm475_vm1, %v2490_v30  ;;  %v2749_v29 = vadd.f32 %v5243_v54, %v2733_v50  ;;  %v2732_v25 = vld [vmem:[#allocation3 + $0x30] sm:$0xff] }
 0x27b   : > { %2505 = vst.msk [vmem:[#allocation3 + $0x50] sm:$0xff] %vm475_vm1, %v2489_v27  ;;  %v2748_v26 = vadd.f32 %v2732_v25, %v5246_v39  ;;  %v4144_v31 = vpop.f32.mrb[62].mxu1  ;;  %v5343_v38 = vpop.f32.mrb[76].mxu0  ;;  %v2992_v18 = vld [vmem:[#allocation3 + $0x18] sm:$0xff] }
 0x27c   : > { %2765 = vst.msk [vmem:[#allocation3 + $0x38] sm:$0xff] %vm475_vm1, %v2749_v29  ;;  %v2492_v36 = vadd.f32 %v4144_v31, %v2476_v34  ;;  %v2444_v33 = vpop.f32.mrb[63].mxu1  ;;  %v5346_v58 = vpop.f32.mrb[77].mxu0  ;;  %v2991_v17 = vld [vmem:[#allocation3 + $0x10] sm:$0xff] }
 0x27d   : > { %2764 = vst.msk [vmem:[#allocation3 + $0x30] sm:$0xff] %vm475_vm1, %v2748_v26  ;;  %v2491_v43 = vadd.f32 %v2475_v56, %v2444_v33  ;;  %v2735_v54 = vld [vmem:[#allocation3 + $0x48] sm:$0xff] }
 0x27e   : > { %2508 = vst.msk [vmem:[#allocation3 + $0x68] sm:$0xff] %vm475_vm1, %v2492_v36  ;;  %v2751_v22 = vadd.f32 %v5253_v60, %v2735_v54  ;;  %v2734_v39 = vld [vmem:[#allocation3 + $0x40] sm:$0xff] }
 0x27f   : > { %2507 = vst.msk [vmem:[#allocation3 + $0x60] sm:$0xff] %vm475_vm1, %v2491_v43  ;;  %v2750_v41 = vadd.f32 %v2734_v39, %v5256_v59  ;;  %v4147_v40 = vpop.f32.mrb[64].mxu1  ;;  %v5353_v42 = vpop.f32.mrb[78].mxu0  ;;  %v2994_v27 = vld [vmem:[#allocation3 + $0x28] sm:$0xff] }
 0x280   : > { %2767 = vst.msk [vmem:[#allocation3 + $0x48] sm:$0xff] %vm475_vm1, %v2751_v22  ;;  %v2494_v55 = vadd.f32 %v4147_v40, %v2478_v51  ;;  %v2454_v49 = vpop.f32.mrb[65].mxu1  ;;  %v5356_v7 = vpop.f32.mrb[79].mxu0  ;;  %v2993_v25 = vld [vmem:[#allocation3 + $0x20] sm:$0xff] }
 0x281   : > { %2766 = vst.msk [vmem:[#allocation3 + $0x40] sm:$0xff] %vm475_vm1, %v2750_v41  ;;  %v2493_v62 = vadd.f32 %v2477_v0, %v2454_v49  ;;  %v2737_v60 = vld [vmem:[#allocation3 + $0x58] sm:$0xff] }
 0x282   : > { %2510 = vst.msk [vmem:[#allocation3 + $0x78] sm:$0xff] %vm475_vm1, %v2494_v55  ;;  %v2753_v63 = vadd.f32 %v5263_v4, %v2737_v60  ;;  %v2736_v59 = vld [vmem:[#allocation3 + $0x50] sm:$0xff] }
 0x283   : > { %2509 = vst.msk [vmem:[#allocation3 + $0x70] sm:$0xff] %vm475_vm1, %v2493_v62  ;;  %v2752_v61 = vadd.f32 %v2736_v59, %v5266_v10  ;;  %v4178_v44 = vpop.f32.mrb[66].mxu1  ;;  %v5363_v45 = vpop.f32.mrb[80].mxu0  ;;  %v2996_v33 = vld [vmem:[#allocation3 + $0x38] sm:$0xff]  ;;  %v5389_v62 = vld [vmem:[%s5509_s6] ss:$0 sm:$0xff] }
 0x284   : > { %2769 = vst.msk [vmem:[#allocation3 + $0x58] sm:$0xff] %vm475_vm1, %v2753_v63  ;;  %v3006_v6 = vadd.f32 %v4178_v44, %v2990_v3  ;;  %v2910_v2 = vpop.f32.mrb[67].mxu1  ;;  %v5366_v57 = vpop.f32.mrb[81].mxu0  ;;  %v2995_v54 = vld [vmem:[#allocation3 + $0x30] sm:$0xff] }
 0x285   : > { %2768 = vst.msk [vmem:[#allocation3 + $0x50] sm:$0xff] %vm475_vm1, %v2752_v61  ;;  %v3005_v12 = vadd.f32 %v2989_v8, %v2910_v2  ;;  %v2739_v4 = vld [vmem:[#allocation3 + $0x68] sm:$0xff] }
 0x286   : > { %3022 = vst.msk [vmem:[#allocation3 + $0x8] sm:$0xff] %vm475_vm1, %v3006_v6  ;;  %v2755_v14 = vadd.f32 %v5273_v13, %v2739_v4  ;;  %v2738_v10 = vld [vmem:[#allocation3 + $0x60] sm:$0xff] }
 0x287   : > { %3021 = vst.msk [vmem:[#allocation3] sm:$0xff] %vm475_vm1, %v3005_v12  ;;  %v2754_v11 = vadd.f32 %v2738_v10, %v5276_v9  ;;  %v4181_v48 = vpop.f32.mrb[68].mxu1  ;;  %v2998_v51 = vld [vmem:[#allocation3 + $0x48] sm:$0xff] }
 0x288   : > { %2771 = vst.msk [vmem:[#allocation3 + $0x68] sm:$0xff] %vm475_vm1, %v2755_v14  ;;  %v3008_v47 = vadd.f32 %v4181_v48, %v2992_v18  ;;  %v2920_v16 = vpop.f32.mrb[69].mxu1  ;;  %v2997_v0 = vld [vmem:[#allocation3 + $0x40] sm:$0xff]  ;;  %v3372_v18 = vld [vmem:[%s4396_s23 + $0x8] sm:$0xff] }
 0x289   : > { %2770 = vst.msk [vmem:[#allocation3 + $0x60] sm:$0xff] %vm475_vm1, %v2754_v11  ;;  %v3007_v21 = vadd.f32 %v2991_v17, %v2920_v16  ;;  %v2741_v13 = vld [vmem:[#allocation3 + $0x78] sm:$0xff] }
 0x28a   : > { %3024 = vst.msk [vmem:[#allocation3 + $0x18] sm:$0xff] %vm475_vm1, %v3008_v47  ;;  %v2757_v30 = vadd.f32 %v5283_v23, %v2741_v13  ;;  %v2740_v9 = vld [vmem:[#allocation3 + $0x70] sm:$0xff] }
 0x28b   : > { %3023 = vst.msk [vmem:[#allocation3 + $0x10] sm:$0xff] %vm475_vm1, %v3007_v21  ;;  %v2756_v20 = vadd.f32 %v2740_v9, %v5286_v32  ;;  %v4184_v52 = vpop.f32.mrb[70].mxu1  ;;  %v3000_v3 = vld [vmem:[#allocation3 + $0x58] sm:$0xff]  ;;  %v3371_v9 = vld [vmem:[%s4396_s23] sm:$0xff] }
 0x28c   : > { %2773 = vst.msk [vmem:[#allocation3 + $0x78] sm:$0xff] %vm475_vm1, %v2757_v30  ;;  %v3010_v50 = vadd.f32 %v4184_v52, %v2994_v27  ;;  %v2930_v29 = vpop.f32.mrb[71].mxu1  ;;  %v2999_v4 = vld [vmem:[#allocation3 + $0x50] sm:$0xff] }
 0x28d   : > { %2772 = vst.msk [vmem:[#allocation3 + $0x70] sm:$0xff] %vm475_vm1, %v2756_v20  ;;  %v3009_v26 = vadd.f32 %v2993_v25, %v2930_v29  ;;  %v3253_v31 = vld [vmem:[#allocation3 + $0x8] sm:$0xff] }
 0x28e   : > { %3026 = vst.msk [vmem:[#allocation3 + $0x28] sm:$0xff] %vm475_vm1, %v3010_v50  ;;  %v3269_v23 = vadd.f32 %v5293_v35, %v3253_v31  ;;  %v3252_v34 = vld [vmem:[#allocation3] sm:$0xff] }
 0x28f   : > { %3025 = vst.msk [vmem:[#allocation3 + $0x20] sm:$0xff] %vm475_vm1, %v3009_v26  ;;  %v3268_v32 = vadd.f32 %v3252_v34, %v5296_v46  ;;  %v4187_v36 = vpop.f32.mrb[72].mxu1  ;;  %v3002_v13 = vld [vmem:[#allocation3 + $0x68] sm:$0xff] }
 0x290   : > { %3285 = vst.msk [vmem:[#allocation3 + $0x8] sm:$0xff] %vm475_vm1, %v3269_v23  ;;  %v3012_v56 = vadd.f32 %v4187_v36, %v2996_v33  ;;  %v2940_v43 = vpop.f32.mrb[73].mxu1  ;;  %v3001_v50 = vld [vmem:[#allocation3 + $0x60] sm:$0xff]  ;;  %v3374_v33 = vld [vmem:[%s4396_s23 + $0x18] sm:$0xff] }
 0x291   : > { %3284 = vst.msk [vmem:[#allocation3] sm:$0xff] %vm475_vm1, %v3268_v32  ;;  %v3011_v22 = vadd.f32 %v2995_v54, %v2940_v43  ;;  %v3255_v39 = vld [vmem:[#allocation3 + $0x18] sm:$0xff] }
 0x292   : > { %3028 = vst.msk [vmem:[#allocation3 + $0x38] sm:$0xff] %vm475_vm1, %v3012_v56  ;;  %v3271_v35 = vadd.f32 %v5303_v53, %v3255_v39  ;;  %v3254_v41 = vld [vmem:[#allocation3 + $0x10] sm:$0xff] }
 0x293   : > { %3027 = vst.msk [vmem:[#allocation3 + $0x30] sm:$0xff] %vm475_vm1, %v3011_v22  ;;  %v3270_v46 = vadd.f32 %v3254_v41, %v5306_v1  ;;  %v4190_v40 = vpop.f32.mrb[74].mxu1  ;;  %v3004_v39 = vld [vmem:[#allocation3 + $0x78] sm:$0xff]  ;;  %v3373_v41 = vld [vmem:[%s4396_s23 + $0x10] sm:$0xff] }
 0x294   : > { %3287 = vst.msk [vmem:[#allocation3 + $0x18] sm:$0xff] %vm475_vm1, %v3271_v35  ;;  %v3014_v55 = vadd.f32 %v4190_v40, %v2998_v51  ;;  %v2950_v49 = vpop.f32.mrb[75].mxu1 }
 0x295   : > { %3286 = vst.msk [vmem:[#allocation3 + $0x10] sm:$0xff] %vm475_vm1, %v3270_v46  ;;  %v3013_v53 = vadd.f32 %v2997_v0, %v2950_v49  ;;  %v3257_v60 = vld [vmem:[#allocation3 + $0x28] sm:$0xff] }
 0x296   : > { %3030 = vst.msk [vmem:[#allocation3 + $0x48] sm:$0xff] %vm475_vm1, %v3014_v55  ;;  %v3273_v1 = vadd.f32 %v5313_v5, %v3257_v60  ;;  %v3256_v63 = vld [vmem:[#allocation3 + $0x20] sm:$0xff]  ;;  %v3003_v55 = vld [vmem:[#allocation3 + $0x70] sm:$0xff] }
 0x297   : > { %v3301_v59 = vld [vmem:[#allocation3 + $0x8] sm:$0xff]  ;;  %3029 = vst.msk [vmem:[#allocation3 + $0x40] sm:$0xff] %vm475_vm1, %v3013_v53  ;;  %v3272_v61 = vadd.f32 %v3256_v63, %v5316_v15  ;;  %v4193_v44 = vpop.f32.mrb[76].mxu1 }
 0x298   : > { %v3324_v6 = vadd.f32 %v5389_v62, %v3301_v59  ;;  %v3300_v2 = vld [vmem:[#allocation3] sm:$0xff]  ;;  %3289 = vst.msk [vmem:[#allocation3 + $0x28] sm:$0xff] %vm475_vm1, %v3273_v1  ;;  %v3016_v8 = vadd.f32 %v4193_v44, %v3000_v3  ;;  %v2960_v12 = vpop.f32.mrb[77].mxu1  ;;  %v3376_v44 = vld [vmem:[%s4396_s23 + $0x28] sm:$0xff] }
 0x299   : > { %v3323_v14 = vadd.f32 %v5389_v62, %v3300_v2  ;;  %3288 = vst.msk [vmem:[#allocation3 + $0x20] sm:$0xff] %vm475_vm1, %v3272_v61  ;;  %v3015_v5 = vadd.f32 %v2999_v4, %v2960_v12  ;;  %v3259_v10 = vld [vmem:[#allocation3 + $0x38] sm:$0xff]  ;;  %v3375_v12 = vld [vmem:[%s4396_s23 + $0x20] sm:$0xff] }
 0x29a   : > { %v3340_v11 = vmul.f32 0.1, %v3324_v6  ;;  %3032 = vst.msk [vmem:[#allocation3 + $0x58] sm:$0xff] %vm475_vm1, %v3016_v8  ;;  %v3275_v15 = vadd.f32 %v5323_v19, %v3259_v10  ;;  %v3258_v48 = vld [vmem:[#allocation3 + $0x30] sm:$0xff] }
 0x29b   : > { %v3339_v47 = vmul.f32 0.1, %v3323_v14  ;;  %v3303_v16 = vld [vmem:[#allocation3 + $0x18] sm:$0xff]  ;;  %3031 = vst.msk [vmem:[#allocation3 + $0x50] sm:$0xff] %vm475_vm1, %v3015_v5  ;;  %v3274_v17 = vadd.f32 %v3258_v48, %v5326_v24  ;;  %v4196_v21 = vpop.f32.mrb[78].mxu1 }
 0x29c   : > { %v3356_v30 = vmax.f32 %v3324_v6, %v3340_v11  ;;  %v3326_v20 = vadd.f32 %v5389_v62, %v3303_v16  ;;  %v3302_v52 = vld [vmem:[#allocation3 + $0x10] sm:$0xff]  ;;  %3291 = vst.msk [vmem:[#allocation3 + $0x38] sm:$0xff] %vm475_vm1, %v3275_v15  ;;  %v3018_v27 = vadd.f32 %v4196_v21, %v3002_v13  ;;  %v2970_v19 = vpop.f32.mrb[79].mxu1 }
 0x29d   : > { %v3355_v29 = vmax.f32 %v3323_v14, %v3339_v47  ;;  %v3325_v25 = vadd.f32 %v5389_v62, %v3302_v52  ;;  %3290 = vst.msk [vmem:[#allocation3 + $0x30] sm:$0xff] %vm475_vm1, %v3274_v17  ;;  %v3017_v24 = vadd.f32 %v3001_v50, %v2970_v19  ;;  %v3261_v26 = vld [vmem:[#allocation3 + $0x48] sm:$0xff]  ;;  %v3378_v47 = vld [vmem:[%s4396_s23 + $0x38] sm:$0xff] }
 0x29e   : > { %v3388_v31 = vadd.f32 %v3372_v18, %v3356_v30  ;;  %v3342_v23 = vmul.f32 0.1, %v3326_v20  ;;  %3034 = vst.msk [vmem:[#allocation3 + $0x68] sm:$0xff] %vm475_vm1, %v3018_v27  ;;  %v3277_v34 = vadd.f32 %v5333_v28, %v3261_v26  ;;  %v3260_v32 = vld [vmem:[#allocation3 + $0x40] sm:$0xff]  ;;  %v3377_v30 = vld [vmem:[%s4396_s23 + $0x30] sm:$0xff] }
 0x29f   : > { %v3387_v36 = vadd.f32 %v3371_v9, %v3355_v29  ;;  %v3341_v56 = vmul.f32 0.1, %v3325_v25  ;;  %v3305_v43 = vld [vmem:[#allocation3 + $0x28] sm:$0xff]  ;;  %3033 = vst.msk [vmem:[#allocation3 + $0x60] sm:$0xff] %vm475_vm1, %v3017_v24  ;;  %v3276_v54 = vadd.f32 %v3260_v32, %v5336_v37  ;;  %v4199_v22 = vpop.f32.mrb[80].mxu1  ;;  %v3379_v32 = vld [vmem:[%s4396_s23 + $0x40] sm:$0xff] }
 0x2a0   : > { %3404 = vst.msk [vmem:[%s4391_s20 + $0x8] sm:$0xff] %vm475_vm1, %v3388_v31  ;;  %v3358_v35 = vmax.f32 %v3326_v20, %v3342_v23  ;;  %v3328_v46 = vadd.f32 %v5389_v62, %v3305_v43  ;;  %v3304_v40 = vld [vmem:[#allocation3 + $0x20] sm:$0xff]  ;;  %3293 = vst.msk [vmem:[#allocation3 + $0x48] sm:$0xff] %vm475_vm1, %v3277_v34  ;;  %v3020_v28 = vadd.f32 %v4199_v22, %v3004_v39  ;;  %v2980_v51 = vpop.f32.mrb[81].mxu1  ;;  %v3380_v24 = vld [vmem:[%s4396_s23 + $0x48] sm:$0xff] }
 0x2a1   : > { %3403 = vst.msk [vmem:[%s4391_s20] sm:$0xff] %vm475_vm1, %v3387_v36  ;;  %v3357_v49 = vmax.f32 %v3325_v25, %v3341_v56  ;;  %v3327_v37 = vadd.f32 %v5389_v62, %v3304_v40  ;;  %3292 = vst.msk [vmem:[#allocation3 + $0x40] sm:$0xff] %vm475_vm1, %v3276_v54  ;;  %v3019_v0 = vadd.f32 %v3003_v55, %v2980_v51  ;;  %v3263_v53 = vld [vmem:[#allocation3 + $0x58] sm:$0xff] }
 0x2a2   : > { %v3390_v60 = vadd.f32 %v3374_v33, %v3358_v35  ;;  %v3344_v1 = vmul.f32 0.1, %v3328_v46  ;;  %3036 = vst.msk [vmem:[#allocation3 + $0x78] sm:$0xff] %vm475_vm1, %v3020_v28  ;;  %v3279_v63 = vadd.f32 %v5343_v38, %v3263_v53  ;;  %v3262_v59 = vld [vmem:[#allocation3 + $0x50] sm:$0xff]  ;;  %v3382_v22 = vld [vmem:[%s4396_s23 + $0x58] sm:$0xff]  ;;  %v3384_v53 = vld [vmem:[%s4396_s23 + $0x68] sm:$0xff] }
 0x2a3   : > { %v3389_v61 = vadd.f32 %v3373_v41, %v3357_v49  ;;  %v3343_v3 = vmul.f32 0.1, %v3327_v37  ;;  %v3307_v6 = vld [vmem:[#allocation3 + $0x38] sm:$0xff]  ;;  %3035 = vst.msk [vmem:[#allocation3 + $0x70] sm:$0xff] %vm475_vm1, %v3019_v0  ;;  %v3278_v2 = vadd.f32 %v3262_v59, %v5346_v58  ;;  %v3383_v59 = vld [vmem:[%s4396_s23 + $0x60] sm:$0xff] }
 0x2a4   : > { %3406 = vst.msk [vmem:[%s4391_s20 + $0x18] sm:$0xff] %vm475_vm1, %v3390_v60  ;;  %v3360_v8 = vmax.f32 %v3328_v46, %v3344_v1  ;;  %v3330_v4 = vadd.f32 %v5389_v62, %v3307_v6  ;;  %v3306_v14 = vld [vmem:[#allocation3 + $0x30] sm:$0xff]  ;;  %3295 = vst.msk [vmem:[#allocation3 + $0x58] sm:$0xff] %vm475_vm1, %v3279_v63 }
 0x2a5   : > { %3405 = vst.msk [vmem:[%s4391_s20 + $0x10] sm:$0xff] %vm475_vm1, %v3389_v61  ;;  %v3359_v38 = vmax.f32 %v3327_v37, %v3343_v3  ;;  %v3329_v5 = vadd.f32 %v5389_v62, %v3306_v14  ;;  %3294 = vst.msk [vmem:[#allocation3 + $0x50] sm:$0xff] %vm475_vm1, %v3278_v2  ;;  %v3265_v58 = vld [vmem:[#allocation3 + $0x68] sm:$0xff]  ;;  %v3381_v46 = vld [vmem:[%s4396_s23 + $0x50] sm:$0xff] }
 0x2a6   : > { %v3392_v10 = vadd.f32 %v3376_v44, %v3360_v8  ;;  %v3346_v11 = vmul.f32 0.1, %v3330_v4  ;;  %v3281_v15 = vadd.f32 %v5353_v42, %v3265_v58  ;;  %v3264_v48 = vld [vmem:[#allocation3 + $0x60] sm:$0xff] }
 0x2a7   : > { %v3391_v18 = vadd.f32 %v3375_v12, %v3359_v38  ;;  %v3345_v16 = vmul.f32 0.1, %v3329_v5  ;;  %v3309_v17 = vld [vmem:[#allocation3 + $0x48] sm:$0xff]  ;;  %v3280_v21 = vadd.f32 %v3264_v48, %v5356_v7 }
 0x2a8   : > { %3408 = vst.msk [vmem:[%s4391_s20 + $0x28] sm:$0xff] %vm475_vm1, %v3392_v10  ;;  %v3362_v13 = vmax.f32 %v3330_v4, %v3346_v11  ;;  %v3332_v9 = vadd.f32 %v5389_v62, %v3309_v17  ;;  %v3308_v20 = vld [vmem:[#allocation3 + $0x40] sm:$0xff]  ;;  %3297 = vst.msk [vmem:[#allocation3 + $0x68] sm:$0xff] %vm475_vm1, %v3281_v15  ;;  %v3386_v4 = vld [vmem:[%s4396_s23 + $0x78] sm:$0xff] }
 0x2a9   : > { %3407 = vst.msk [vmem:[%s4391_s20 + $0x20] sm:$0xff] %vm475_vm1, %v3391_v18  ;;  %v3361_v42 = vmax.f32 %v3329_v5, %v3345_v16  ;;  %v3331_v52 = vadd.f32 %v5389_v62, %v3308_v20  ;;  %3296 = vst.msk [vmem:[#allocation3 + $0x60] sm:$0xff] %vm475_vm1, %v3280_v21  ;;  %v3267_v7 = vld [vmem:[#allocation3 + $0x78] sm:$0xff]  ;;  %v3385_v5 = vld [vmem:[%s4396_s23 + $0x70] sm:$0xff] }
 0x2aa   : > { %v3394_v27 = vadd.f32 %v3378_v47, %v3362_v13  ;;  %v3348_v19 = vmul.f32 0.1, %v3332_v9  ;;  %v3283_v50 = vadd.f32 %v5363_v45, %v3267_v7  ;;  %v3266_v29 = vld [vmem:[#allocation3 + $0x70] sm:$0xff] }
 0x2ab   : > { %v3393_v25 = vadd.f32 %v3377_v30, %v3361_v42  ;;  %v3347_v26 = vmul.f32 0.1, %v3331_v52  ;;  %v3311_v31 = vld [vmem:[#allocation3 + $0x58] sm:$0xff]  ;;  %v3282_v23 = vadd.f32 %v3266_v29, %v5366_v57 }
 0x2ac   : > { %3410 = vst.msk [vmem:[%s4391_s20 + $0x38] sm:$0xff] %vm475_vm1, %v3394_v27  ;;  %v3364_v34 = vmax.f32 %v3332_v9, %v3348_v19  ;;  %v3334_v36 = vadd.f32 %v5389_v62, %v3311_v31  ;;  %v3310_v33 = vld [vmem:[#allocation3 + $0x50] sm:$0xff]  ;;  %3299 = vst.msk [vmem:[#allocation3 + $0x78] sm:$0xff] %vm475_vm1, %v3283_v50 }
 0x2ad   : > { %3409 = vst.msk [vmem:[%s4391_s20 + $0x30] sm:$0xff] %vm475_vm1, %v3393_v25  ;;  %v3363_v45 = vmax.f32 %v3331_v52, %v3347_v26  ;;  %v3333_v56 = vadd.f32 %v5389_v62, %v3310_v33  ;;  %3298 = vst.msk [vmem:[#allocation3 + $0x70] sm:$0xff] %vm475_vm1, %v3282_v23 }
 0x2ae   : > { %v3396_v57 = vadd.f32 %v3380_v24, %v3364_v34  ;;  %v3350_v43 = vmul.f32 0.1, %v3334_v36 }
 0x2af   : > { %v3395_v54 = vadd.f32 %v3379_v32, %v3363_v45  ;;  %v3349_v39 = vmul.f32 0.1, %v3333_v56  ;;  %v3313_v35 = vld [vmem:[#allocation3 + $0x68] sm:$0xff] }
 0x2b0   : > { %3412 = vst.msk [vmem:[%s4391_s20 + $0x48] sm:$0xff] %vm475_vm1, %v3396_v57  ;;  %v3366_v41 = vmax.f32 %v3334_v36, %v3350_v43  ;;  %v3336_v40 = vadd.f32 %v5389_v62, %v3313_v35  ;;  %v3312_v28 = vld [vmem:[#allocation3 + $0x60] sm:$0xff] }
 0x2b1   : > { %3411 = vst.msk [vmem:[%s4391_s20 + $0x40] sm:$0xff] %vm475_vm1, %v3395_v54  ;;  %v3365_v51 = vmax.f32 %v3333_v56, %v3349_v39  ;;  %v3335_v55 = vadd.f32 %v5389_v62, %v3312_v28 }
 0x2b2   : > { %v3398_v49 = vadd.f32 %v3382_v22, %v3366_v41  ;;  %v3352_v37 = vmul.f32 0.1, %v3336_v40 }
 0x2b3   : > { %v3397_v0 = vadd.f32 %v3381_v46, %v3365_v51  ;;  %v3351_v60 = vmul.f32 0.1, %v3335_v55  ;;  %v3315_v1 = vld [vmem:[#allocation3 + $0x78] sm:$0xff] }
 0x2b4   : > { %3414 = vst.msk [vmem:[%s4391_s20 + $0x58] sm:$0xff] %vm475_vm1, %v3398_v49  ;;  %v3368_v63 = vmax.f32 %v3336_v40, %v3352_v37  ;;  %v3338_v61 = vadd.f32 %v5389_v62, %v3315_v1  ;;  %v3314_v44 = vld [vmem:[#allocation3 + $0x70] sm:$0xff] }
 0x2b5   : > { %3413 = vst.msk [vmem:[%s4391_s20 + $0x50] sm:$0xff] %vm475_vm1, %v3397_v0  ;;  %v3367_v3 = vmax.f32 %v3335_v55, %v3351_v60  ;;  %v3337_v6 = vadd.f32 %v5389_v62, %v3314_v44 }
 0x2b6   : > { %v3400_v2 = vadd.f32 %v3384_v53, %v3368_v63  ;;  %v3354_v8 = vmul.f32 0.1, %v3338_v61 }
 0x2b7   : > { %v3399_v12 = vadd.f32 %v3383_v59, %v3367_v3  ;;  %v3353_v14 = vmul.f32 0.1, %v3337_v6 }
 0x2b8   : > { %3416 = vst.msk [vmem:[%s4391_s20 + $0x68] sm:$0xff] %vm475_vm1, %v3400_v2  ;;  %v3370_v38 = vmax.f32 %v3338_v61, %v3354_v8 }
 0x2b9   : > { %3415 = vst.msk [vmem:[%s4391_s20 + $0x60] sm:$0xff] %vm475_vm1, %v3399_v12  ;;  %v3369_v58 = vmax.f32 %v3337_v6, %v3353_v14 }
 0x2ba   : > { %v3402_v10 = vadd.f32 %v3386_v4, %v3370_v38 }
 0x2bb   : > { %v3401_v11 = vadd.f32 %v3385_v5, %v3369_v58 }
 0x2bc   : > { %3418 = vst.msk [vmem:[%s4391_s20 + $0x78] sm:$0xff] %vm475_vm1, %v3402_v10 }
 0x2bd   : > { %3417 = vst.msk [vmem:[%s4391_s20 + $0x70] sm:$0xff] %vm475_vm1, %v3401_v11 }
 0x2be PF: > { %s17_s28 = sadd.s32 1, %s4308_s28   ;;  %s5511_s24 = smov %s4300_s26 }
 0x2bf   : > { %p14_p12 = scmp.ge.s32.totalorder %s17_s28, 6   ;;  %s5512_s25 = smov %s4304_s27 }
 0x2c0   : > { %s5513_s26 = smov %s5516_s29  ;;  %s5514_s27 = smov %s5520_s30 }
 0x2c1   :  { %16 = sbr.rel (!%p14_p12) target bundleno = 3 (0x3), region = 111 }

</bundles_post_ra>
